<compile_context>
chip_gen: v5e
topology: v5e:2x2
jax: 0.10.0
libtpu: 0.0.40
codegen_flags: <defaults>
</compile_context>

<pallas_src>
import jax
import jax.numpy as jnp
from jax.experimental import pallas as pl
from jax.experimental.pallas import tpu as pltpu


def _ffn_kernel(x_ref, w1_ref, w3_ref, w2_ref, o_ref, acc_ref):
    # x_ref:  (tm, dim)   input rows (constant across the hidden axis j)
    # w1_ref: (dim, tn)   contraction-major W1 tile
    # w3_ref: (dim, tn)   contraction-major W3 tile
    # w2_ref: (tn, dim)   contraction-major W2 tile
    # o_ref:  (tm, dim)   output tile (written once, on the last hidden tile)
    # acc_ref:(tm, dim)   f32 accumulator scratch
    j = pl.program_id(1)
    nj = pl.num_programs(1)

    @pl.when(j == 0)
    def _():
        acc_ref[...] = jnp.zeros_like(acc_ref)

    x = x_ref[...]
    h1 = jnp.dot(x, w1_ref[...], preferred_element_type=jnp.float32)
    h3 = jnp.dot(x, w3_ref[...], preferred_element_type=jnp.float32)
    # SwiGLU gate in f32 (EUP/VPU work hides under the streamed-weight matmuls).
    h = (h1 * jax.nn.sigmoid(h1)) * h3
    # Partial second matmul for this hidden tile.  (h is downcast to the
    # weight dtype before the MXU -- documented precision tradeoff for bf16.)
    partial = jnp.dot(h.astype(w2_ref.dtype), w2_ref[...],
                      preferred_element_type=jnp.float32)

    @pl.when(j < nj - 1)
    def _():
        acc_ref[...] += partial

    @pl.when(j == nj - 1)
    def _():
        # Fuse the final accumulate into the store: saves one full (tm, dim)
        # f32 read-modify-write on the last hidden tile.
        o_ref[...] = (acc_ref[...] + partial).astype(o_ref.dtype)


def _physical_vmem_bytes():
    """Best-effort physical VMEM of the running chip."""
    try:
        info = pltpu.get_tpu_info()
        cap = int(getattr(info, "vmem_capacity_bytes", 0))
        if cap > 0:
            return cap
    except Exception:
        pass
    return 64 * 1024 * 1024  # conservative default (v7x per-TensorCore)


def _block_vmem_bytes(tm, tn, dim, x_bytes, w_bytes, out_bytes):
    """Estimate VMEM footprint of the double-buffered blocks + f32 scratch."""
    xb = 2 * tm * dim * x_bytes                  # x rows, double-buffered
    ob = 2 * tm * dim * out_bytes                # output rows, double-buffered
    wb = 2 * 3 * dim * tn * w_bytes              # W1/W3/W2 tiles, double-buffered
    acc = tm * dim * 4                           # f32 accumulator scratch
    return xb + ob + wb + acc


def _pick_tn(hidden):
    """Largest multiple of 128 (<= 512) dividing hidden; graceful fallbacks."""
    if hidden <= 512:
        return hidden
    for cand in (512, 384, 256, 128):
        if hidden % cand == 0:
            return cand
    for cand in range(512, 7, -8):               # keep sublane dim % 8 == 0
        if hidden % cand == 0:
            return cand
    return hidden                                # last resort: single j step


def _pick_tm(M, dim, tn, x_bytes, w_bytes, out_bytes, vmem_budget):
    def fits(t):
        return _block_vmem_bytes(t, tn, dim, x_bytes, w_bytes,
                                 out_bytes) <= vmem_budget
    # Largest tile that fits the VMEM budget while keeping >= 2 row blocks
    # (so both v7x TensorCores get work on the parallel axis).
    for cand in (1024, 512, 256, 128):
        if M >= 2 * cand and fits(cand):
            return cand
    # Small M (< 256) or pathological budget: take the rows whole / minimal.
    return M if M < 256 else 128


def feed_forward_pallas(x, w1, w2, w3, *, tm=None, tn=None,
                        vmem_limit_bytes=None):
    """SwiGLU FFN forward.

    x:  (..., dim)
    w1: (hidden, dim)  torch nn.Linear layout (out_features, in_features)
    w2: (dim, hidden)
    w3: (hidden, dim)
    """
    orig_shape = x.shape
    dim = orig_shape[-1]
    hidden = w1.shape[0]
    assert w1.shape == (hidden, dim)
    assert w3.shape == (hidden, dim)
    assert w2.shape == (dim, hidden)

    x2d = x.reshape(-1, dim)
    M = x2d.shape[0]

    x_bytes = jnp.dtype(x.dtype).itemsize
    w_bytes = jnp.dtype(w1.dtype).itemsize
    out_bytes = x_bytes

    vmem_cap = _physical_vmem_bytes()
    vmem_budget = int(vmem_cap * 0.70)

    # ---- tile selection -------------------------------------------------
    if tn is None:
        tn = _pick_tn(hidden)
    assert hidden % tn == 0, "tn must divide hidden"
    if tm is None:
        tm = _pick_tm(M, dim, tn, x_bytes, w_bytes, out_bytes, vmem_budget)

    # Explicit scoped-VMEM budget (defaults of 16/32 MiB reject real tiles).
    if vmem_limit_bytes is None:
        need = _block_vmem_bytes(tm, tn, dim, x_bytes, w_bytes, out_bytes)
        vmem_limit_bytes = int(min(max(need * 5 // 4, 32 * 1024 * 1024),
                                   vmem_cap - 4 * 1024 * 1024))

    # Pad M so the grid divides evenly; padded rows are zeros -> zero output,
    # sliced off below.
    m_pad = (-M) % tm
    if m_pad:
        x2d = jnp.pad(x2d, ((0, m_pad), (0, 0)))
    Mp = M + m_pad

    # One-time wrapper-side transposes to contraction-major layout so the
    # kernel never needs a per-step XLU tile transpose.
    w1t = w1.T          # (dim, hidden)
    w3t = w3.T          # (dim, hidden)
    w2t = w2.T          # (hidden, dim)

    grid = (Mp // tm, hidden // tn)

    out2d = pl.pallas_call(
        _ffn_kernel,
        out_shape=jax.ShapeDtypeStruct((Mp, dim), x.dtype),
        grid_spec=pltpu.PrefetchScalarGridSpec(
            num_scalar_prefetch=0,
            grid=grid,
            in_specs=[
                pl.BlockSpec((tm, dim), lambda i, j: (i, 0)),   # x rows
                pl.BlockSpec((dim, tn), lambda i, j: (0, j)),   # W1^T tile
                pl.BlockSpec((dim, tn), lambda i, j: (0, j)),   # W3^T tile
                pl.BlockSpec((tn, dim), lambda i, j: (j, 0)),   # W2^T tile
            ],
            out_specs=pl.BlockSpec((tm, dim), lambda i, j: (i, 0)),
            scratch_shapes=[pltpu.VMEM((tm, dim), jnp.float32)],
        ),
        compiler_params=pltpu.CompilerParams(
            dimension_semantics=("parallel", "arbitrary"),
            vmem_limit_bytes=int(vmem_limit_bytes),
        ),
    )(x2d, w1t, w3t, w2t)

    if m_pad:
        out2d = out2d[:M]
    return out2d.reshape(orig_shape)


def _compute_hidden_dim(dim, hidden_dim, multiple_of, ffn_dim_multiplier):
    hidden_dim = int(2 * hidden_dim / 3)
    if ffn_dim_multiplier is not None:
        hidden_dim = int(ffn_dim_multiplier * hidden_dim)
    hidden_dim = multiple_of * ((hidden_dim + multiple_of - 1) // multiple_of)
    return hidden_dim


def _trunc_normal(key, shape, std):
    # matches nn.init.trunc_normal_(mean=0, std=std, a=-2, b=2): truncation
    # bounds are absolute (+/- 2), i.e. +/- (2/std) standard deviations.
    return std * jax.random.truncated_normal(
        key, lower=-2.0 / std, upper=2.0 / std, shape=shape, dtype=jnp.float32)


if __name__ == "__main__":
    # Module config: dim=128, hidden_dim=256, multiple_of=128
    #   -> actual hidden = 128 * ceil(int(2*256/3)/128) = 256
    dim = 128
    hidden_dim_cfg = 256
    multiple_of = 128
    ffn_dim_multiplier = None
    hidden = _compute_hidden_dim(dim, hidden_dim_cfg, multiple_of,
                                 ffn_dim_multiplier)

    batch, seq = 2, 128          # M = 256 -> auto tm=128 (two parallel blocks)
    init_std = 0.02

    key = jax.random.PRNGKey(0)
    kx, k1, k2, k3 = jax.random.split(key, 4)

    x = jax.random.normal(kx, (batch, seq, dim), dtype=jnp.float32)
    # torch Linear weight layout: (out_features, in_features)
    w1 = _trunc_normal(k1, (hidden, dim), 0.02)       # dim -> hidden
    w2 = _trunc_normal(k2, (dim, hidden), init_std)   # hidden -> dim
    w3 = _trunc_normal(k3, (hidden, dim), init_std)   # dim -> hidden

    # Pure-JAX reference
    h_ref = jax.nn.silu(x @ w1.T) * (x @ w3.T)
    y_ref = h_ref @ w2.T

    # f32 path, auto tiles (single hidden tile).
    y = feed_forward_pallas(x, w1, w2, w3)
    y = jax.block_until_ready(y)
    assert y.shape == (batch, seq, dim)
    assert jnp.allclose(y, y_ref, atol=1e-4, rtol=1e-4), "f32 mismatch"

    # f32 path, tn=128 so the hidden-tiled accumulator path is exercised.
    y2 = feed_forward_pallas(x, w1, w2, w3, tn=128)
    y2 = jax.block_until_ready(y2)
    assert jnp.allclose(y2, y_ref, atol=1e-4, rtol=1e-4), "f32 (tn=128) mismatch"

    # bf16 path (MXU-peak / halved HBM weight traffic); loose tolerance vs f32.
    xb, w1b, w2b, w3b = (a.astype(jnp.bfloat16) for a in (x, w1, w2, w3))
    yb = feed_forward_pallas(xb, w1b, w2b, w3b, tn=128)
    yb = jax.block_until_ready(yb)
    assert jnp.allclose(yb.astype(jnp.float32), y_ref, atol=2e-3, rtol=5e-2), \
        "bf16 mismatch"

    print("KERNEL_OK")
</pallas_src>

<mosaic_0001>
module attributes {stable_mosaic.version = 11 : i64} {
  func.func @_ffn_kernel(%arg0: i32, %arg1: i32, %arg2: memref<128x128xf32, #tpu.memory_space<vmem>>, %arg3: memref<128x256xf32, #tpu.memory_space<vmem>>, %arg4: memref<128x256xf32, #tpu.memory_space<vmem>>, %arg5: memref<256x128xf32, #tpu.memory_space<vmem>>, %arg6: memref<128x128xf32, #tpu.memory_space<vmem>>, %arg7: memref<128x128xf32, #tpu.memory_space<vmem>>) attributes {dimension_semantics = [#tpu.dimension_semantics<parallel>, #tpu.dimension_semantics<arbitrary>], iteration_bounds = array<i64: 2, 1>, scalar_prefetch = 0 : i64, scratch_operands = 1 : i64, tpu.core_type = #tpu.core_type<tc>, window_params = [{transform_indices = @transform_0, window_bounds = array<i64: 128, 128>}, {transform_indices = @transform_1, window_bounds = array<i64: 128, 256>}, {transform_indices = @transform_2, window_bounds = array<i64: 128, 256>}, {transform_indices = @transform_3, window_bounds = array<i64: 256, 128>}, {transform_indices = @transform_4, window_bounds = array<i64: 128, 128>}]} {
    %c0_i32 = arith.constant 0 : i32
    %0 = arith.cmpi eq, %arg1, %c0_i32 : i32
    %1 = arith.extui %0 : i1 to i32
    %c0_i32_0 = arith.constant 0 : i32
    %2 = arith.cmpi ne, %1, %c0_i32_0 : i32
    scf.if %2 {
      %cst_15 = arith.constant 0.000000e+00 : f32
      %23 = vector.broadcast %cst_15 : f32 to vector<128x128xf32>
      %c0_16 = arith.constant 0 : index
      %c0_17 = arith.constant 0 : index
      %24 = vector.load %arg7[%c0_16, %c0_17] : memref<128x128xf32, #tpu.memory_space<vmem>>, vector<128x128xf32>
      tpu.vector_store %arg7[%c0_16, %c0_17], %23 {strides = array<i32>} : memref<128x128xf32, #tpu.memory_space<vmem>>, vector<128x128xf32>,
    } else {
    }
    %c0 = arith.constant 0 : index
    %c0_1 = arith.constant 0 : index
    %3 = vector.load %arg2[%c0, %c0_1] : memref<128x128xf32, #tpu.memory_space<vmem>>, vector<128x128xf32>
    %c0_2 = arith.constant 0 : index
    %c0_3 = arith.constant 0 : index
    %4 = vector.load %arg3[%c0_2, %c0_3] : memref<128x256xf32, #tpu.memory_space<vmem>>, vector<128x256xf32>
    %cst = arith.constant dense<0.000000e+00> : vector<128x256xf32>
    %5 = tpu.matmul %3, %4, %cst {dimension_numbers = #tpu.dot_dimension_numbers<[1], [0], [0], [1], [0, 0, 1, 1], [], []>} : vector<128x128xf32>, vector<128x256xf32>, vector<128x256xf32> -> vector<128x256xf32>
    %c0_4 = arith.constant 0 : index
    %c0_5 = arith.constant 0 : index
    %6 = vector.load %arg4[%c0_4, %c0_5] : memref<128x256xf32, #tpu.memory_space<vmem>>, vector<128x256xf32>
    %cst_6 = arith.constant dense<0.000000e+00> : vector<128x256xf32>
    %7 = tpu.matmul %3, %6, %cst_6 {dimension_numbers = #tpu.dot_dimension_numbers<[1], [0], [0], [1], [0, 0, 1, 1], [], []>} : vector<128x128xf32>, vector<128x256xf32>, vector<128x256xf32> -> vector<128x256xf32>
    %8 = arith.negf %5 : vector<128x256xf32>
    %9 = math.exp %8 : vector<128x256xf32>
    %cst_7 = arith.constant 1.000000e+00 : f32
    %10 = vector.broadcast %cst_7 : f32 to vector<128x256xf32>
    %11 = arith.addf %10, %9 : vector<128x256xf32>
    %12 = arith.divf %10, %11 : vector<128x256xf32>
    %13 = arith.mulf %5, %12 : vector<128x256xf32>
    %14 = arith.mulf %13, %7 : vector<128x256xf32>
    %c0_8 = arith.constant 0 : index
    %c0_9 = arith.constant 0 : index
    %15 = vector.load %arg5[%c0_8, %c0_9] : memref<256x128xf32, #tpu.memory_space<vmem>>, vector<256x128xf32>
    %cst_10 = arith.constant dense<0.000000e+00> : vector<128x128xf32>
    %16 = tpu.matmul %14, %15, %cst_10 {dimension_numbers = #tpu.dot_dimension_numbers<[1], [0], [0], [1], [0, 0, 1, 1], [], []>} : vector<128x256xf32>, vector<256x128xf32>, vector<128x128xf32> -> vector<128x128xf32>
    %c0_i32_11 = arith.constant 0 : i32
    %17 = arith.cmpi slt, %arg1, %c0_i32_11 : i32
    %18 = arith.extui %17 : i1 to i32
    %c0_i32_12 = arith.constant 0 : i32
    %19 = arith.cmpi ne, %18, %c0_i32_12 : i32
    scf.if %19 {
      %c0_15 = arith.constant 0 : index
      %c0_16 = arith.constant 0 : index
      %23 = vector.load %arg7[%c0_15, %c0_16] : memref<128x128xf32, #tpu.memory_space<vmem>>, vector<128x128xf32>
      %24 = arith.addf %23, %16 : vector<128x128xf32>
      %c0_17 = arith.constant 0 : index
      %c0_18 = arith.constant 0 : index
      %25 = vector.load %arg7[%c0_17, %c0_18] : memref<128x128xf32, #tpu.memory_space<vmem>>, vector<128x128xf32>
      tpu.vector_store %arg7[%c0_17, %c0_18], %24 {strides = array<i32>} : memref<128x128xf32, #tpu.memory_space<vmem>>, vector<128x128xf32>,
    } else {
    }
    %c0_i32_13 = arith.constant 0 : i32
    %20 = arith.cmpi eq, %arg1, %c0_i32_13 : i32
    %21 = arith.extui %20 : i1 to i32
    %c0_i32_14 = arith.constant 0 : i32
    %22 = arith.cmpi ne, %21, %c0_i32_14 : i32
    scf.if %22 {
      %c0_15 = arith.constant 0 : index
      %c0_16 = arith.constant 0 : index
      %23 = vector.load %arg7[%c0_15, %c0_16] : memref<128x128xf32, #tpu.memory_space<vmem>>, vector<128x128xf32>
      %24 = arith.addf %23, %16 : vector<128x128xf32>
      %c0_17 = arith.constant 0 : index
      %c0_18 = arith.constant 0 : index
      %25 = vector.load %arg6[%c0_17, %c0_18] : memref<128x128xf32, #tpu.memory_space<vmem>>, vector<128x128xf32>
      tpu.vector_store %arg6[%c0_17, %c0_18], %24 {strides = array<i32>} : memref<128x128xf32, #tpu.memory_space<vmem>>, vector<128x128xf32>,
    } else {
    }
    return
  }
  func.func @transform_0(%arg0: i32, %arg1: i32) -> (i32, i32) {
    %c0_i32 = arith.constant 0 : i32
    %c0_i32_0 = arith.constant 0 : i32
    return %arg0, %c0_i32 : i32, i32
  }
  func.func @transform_1(%arg0: i32, %arg1: i32) -> (i32, i32) {
    %c0_i32 = arith.constant 0 : i32
    %c0_i32_0 = arith.constant 0 : i32
    return %c0_i32, %arg1 : i32, i32
  }
  func.func @transform_2(%arg0: i32, %arg1: i32) -> (i32, i32) {
    %c0_i32 = arith.constant 0 : i32
    %c0_i32_0 = arith.constant 0 : i32
    return %c0_i32, %arg1 : i32, i32
  }
  func.func @transform_3(%arg0: i32, %arg1: i32) -> (i32, i32) {
    %c0_i32 = arith.constant 0 : i32
    %c0_i32_0 = arith.constant 0 : i32
    return %arg1, %c0_i32 : i32, i32
  }
  func.func @transform_4(%arg0: i32, %arg1: i32) -> (i32, i32) {
    %c0_i32 = arith.constant 0 : i32
    %c0_i32_0 = arith.constant 0 : i32
    return %arg0, %c0_i32 : i32, i32
  }
}

</mosaic_0001>

<bundles_post_ra>
// kernel: tpu_custom_call.1
= control target key start
LH: loop header
LB: loop body
LE: loop exit
PB: predicated region body
PF: predicated region fallthrough
CT: control target
= control target key end

     0   :  { %s3611_s0 = inlined_call_operand.hbm [shape: f32[256,128], index: 0, kind: input, shape index: {}]   ;;  %s3612_s1 = inlined_call_operand.hbm [shape: f32[128,256], index: 1, kind: input, shape index: {}]   ;;  %s3613_s2 = inlined_call_operand.hbm [shape: f32[128,256], index: 2, kind: input, shape index: {}]   ;;  %s3614_s3 = inlined_call_operand.hbm [shape: f32[256,128], index: 3, kind: input, shape index: {}]   ;;  %s3615_s4 = inlined_call_operand.hbm [shape: f32[256,128], index: 4, kind: output, shape index: {}]  }
   0x1   :  { %3631 = sst [smem:[#allocation30_spill]] %s3612_s1 }
   0x2   :  { %3632 = sst [smem:[#allocation31_spill]] %s3613_s2 }
   0x3   :  { %9 = vsyncpa [#allocation4], 0 }
   0x4   :  { %11 = vsyncpa [#allocation4 + $0x1], 0 }
   0x5   :  { %12 = vsyncpa [#allocation7], 0 }
   0x6   :  { %13 = vsyncpa [#allocation10], 0 }
   0x7   :  { %14 = vsyncpa [#allocation5], 0 }
   0x8   :  { %16 = vsyncpa [#allocation5 + $0x1], 0  ;;  %s2298_s15 = smov 0   ;;  %s2300_s16 = smov 0  }
   0x9   :  { %s2302_s17 = smov 0   ;;  %s2304_s18 = smov 0  }
   0xa   :  { %s2306_s19 = smov 0   ;;  %s2308_s20 = smov 0  }
   0xb LB: > { %s1738_s21 = sadd.s32 4294967295, %s2262_s20   ;;  %s1739_s22 = sadd.s32 4294967294, %s2262_s20   ;;  %s2262_s20 = sphi %s2308_s20, %s22_s20   ;;  %s2258_s19 = sphi %s2306_s19, %s3777_s19   ;;  %s2254_s18 = sphi %s2304_s18, %s3776_s18   ;;  %s2250_s17 = sphi %s2302_s17, %s3775_s17   ;;  %s2246_s16 = sphi %s2300_s16, %s3774_s16   ;;  %s2242_s15 = sphi %s2298_s15, %s3773_s15  }
   0xc   : > { %p54_p0 = scmp.ne.s32.totalorder %s2246_s16, %s2242_s15  ;;  %p2332_p1 = scmp.eq.s32.totalorder %s1738_s21, 0 }
   0xd   : > { %p2336_p2 = scmp.eq.s32.totalorder %s1738_s21, 1  ;;  %p162_p3 = scmp.eq.s32.totalorder %s1739_s22, 1 }
   0xe   : > { %p2342_p4 = por %p2332_p1, %p54_p0  ;;  %p1740_p5 = scmp.ge.s32.totalorder %s2262_s20, 1 }
   0xf   : > { %p2347_p6 = por %p162_p3, %p54_p0  ;;  %p169_p7 = scmp.lt.s32.totalorder %s2262_s20, 3 }
  0x10   : > { %s3637_s1 = sld [smem:[#allocation30_spill]]  ;;  %s2264_s5 = smov [#allocation6]  }
  0x11   : > { %p2355_p8 = pnand %p1740_p5, %p169_p7  ;;  %s185_s6 = sshll.u32 %s2264_s5, 4  ;;  %s186_s6 = int_to_ptr.vmem [resolvable:$true] %s185_s6 }
  0x12   : > { %p1744_p11 = scmp.ge.s32.totalorder %s2262_s20, 2  ;;  %s3640_s2 = sld [smem:[#allocation31_spill]] }
  0x13   : > { %p1841_p9 = pneg %p2355_p8  ;;  %s2265_s11 = smov 256  }
  0x14   : > { %s2266_s12 = smov 16   ;;  %s2267_s13 = smov [#allocation8]  }
  0x15   : > { %p2363_p10 = pnand %p1841_p9, %p2332_p1  ;;  %s202_s14 = sshll.u32 %s2267_s13, 4  ;;  %s203_s14 = int_to_ptr.vmem [resolvable:$true] %s202_s14 }
  0x16   : > { %s183_s29 = sshll.u32 %s3637_s1, 4  ;;  %s217_s27 = sshll.u32 %s3614_s3, 4  ;;  %s184_s29 = int_to_ptr.hbm [resolvable:$true] %s183_s29  ;;  %s218_s27 = int_to_ptr.hbm [resolvable:$true] %s217_s27 }
  0x17   : > { %1844 = dma.hbm_to_vmem [thread:$0]  (!%p2363_p10), %s184_s29, 4096, %s186_s6, [#allocation7], %s2265_s11, %s2265_s11, %s2266_s12  }
  0x18   : > { %s200_s10 = sshll.u32 %s3640_s2, 4  ;;  %s2268_s28 = smov [#allocation9]   ;;  %s201_s10 = int_to_ptr.hbm [resolvable:$true] %s200_s10 }
  0x19   : > { %1847 = dma.hbm_to_vmem [thread:$0]  (!%p2363_p10), %s201_s10, 4096, %s203_s14, [#allocation7], %s2265_s11, %s2265_s11, %s2266_s12  }
  0x1a   : > { %s219_s5 = sshll.u32 %s2268_s28, 4  ;;  %s3616_s8 = smov 128   ;;  %s220_s5 = int_to_ptr.vmem [resolvable:$true] %s219_s5 }
  0x1b   : > { %s3617_s29 = smov 8   ;;  %s41_s6 = sadd.s32 1, %s2250_s17 }
  0x1c   : > { %1850 = dma.hbm_to_vmem [thread:$0]  (!%p2363_p10), %s218_s27, 4096, %s220_s5, [#allocation10], %s3616_s8, %s3616_s8, %s3617_s29  }
  0x1d   : > { %s34_s9 = sadd.s32 1, %s2258_s19  ;;  %p48_p12 = scmp.ne.s32.totalorder %s2250_s17, %s2246_s16 }
  0x1e   : > { %p36_p13 = scmp.ge.s32.totalorder %s34_s9, 2  ;;  %p49_p0 = scmp.eq.s32.totalorder %s2262_s20, 0 }
  0x1f   : > { %p2390_p3 = por %p2336_p2, %p48_p12  ;;  %p1862_p5 = scmp.lt.s32.totalorder %s2262_s20, 2 }
  0x20   : > { %s3779_s9 = smov (%p36_p13, %s34_s9), 0  ;;  %p2397_p7 = por %p49_p0, %p48_p12 }
  0x21   : > { %s233_s11 = sand.u32 1, %s2250_s17   ;;  %s38_s12 = ssub.s32 %s2258_s19, %s3779_s9 }
  0x22   : > { %p39_p9 = scmp.eq.s32.totalorder %s38_s12, 0  ;;  %s1745_s13 = sshll.u32 %s233_s11, 7 }
  0x23   : > { %s1791_s14 = sshll.u32 %s2258_s19, 7  ;;  %s237_s28 = scalar_lea.vmem [#allocation3], %s1745_s13 }
  0x24   : > { %s2406_s24 = scalar_select %p39_p9, %s2250_s17, %s41_s6  }
  0x25   : > { %s242_s27 = scalar_lea.hbm %s3611_s0, %s1791_s14  ;;  %s245_s5 = sshll.u32 %s237_s28, 4  ;;  %s246_s5 = int_to_ptr.vmem [resolvable:$true] %s245_s5 }
  0x26   : > { %s243_s8 = sshll.u32 %s242_s27, 4  ;;  %p1852_p2 = pnand %p1862_p5, %p2397_p7  ;;  %s244_s8 = int_to_ptr.hbm [resolvable:$true] %s243_s8 }
  0x27   : > { %s234_s29 = scalar_lea.sflag [#allocation4], %s233_s11  ;;  %s3643_s1 = smov 8  }
  0x28   : > { %s3644_s2 = smov 128   ;;  %257 = sbr.rel (%p2355_p8) target bundleno = 552 (0x228), region = 36 }
  0x29   : > { %1854 = dma.hbm_to_vmem [thread:$0]  (!%p1852_p2), %s244_s8, 2048, %s246_s5, %s234_s29, %s3644_s2, %s3644_s2, %s3643_s1  }
  0x2d   : > { %s2421_s6 = sand.u32 1, %s2246_s16  }
  0x2e   : > { %s1749_s12 = sshll.u32 %s2421_s6, 7  ;;  %s260_s13 = scalar_lea.sflag [#allocation4], %s2421_s6 }
  0x2f   : > { %s2427_s7 = scalar_lea.vmem [#allocation3], %s1749_s12 }
  0x30   : > { %2225 = dma.done.wait (%p2342_p4), %s260_s13, 2048  }
  0x31   : > { %2227 = vsyncadd (%p2342_p4), %s260_s13, 4294965248 }
  0x32   : > { %2229 = dma.done.wait (%p2332_p1), [#allocation7], 8192  }
  0x33   : > { %2231 = vsyncadd (%p2332_p1), [#allocation7], 4294959104 }
  0x34   : > { %2233 = dma.done.wait (%p2332_p1), [#allocation10], 4096  }
  0x35   : > { %2235 = vsyncadd (%p2332_p1), [#allocation10], 4294963200  ;;  %v375_v0 = vld [vmem:[#allocation6 + $0xf0] sm:$0xff]  ;;  %v376_v1 = vld [vmem:[#allocation6 + $0xf8] sm:$0xff]  ;;  %s3554_s1 = scalar_lea.vmem [#allocation11], %s1749_s12  ;;  %s1792_s2 = sshll.u32 %s2254_s18, 7 }
  0x36   : > { %v373_v2 = vld [vmem:[#allocation6 + $0xe0] sm:$0xff]  ;;  %1793 = vmatpush.msra.mxu2 %v375_v0  ;;  %1809 = vmatpush.msra.mxu3 %v376_v1  ;;  %v374_v3 = vld [vmem:[#allocation6 + $0xe8] sm:$0xff]  ;;  %v371_v4 = vld [vmem:[#allocation6 + $0xd0] sm:$0xff]  ;;  %s1618_s30 = scalar_lea.hbm %s3615_s4, %s1792_s2  ;;  %s1619_s8 = sshll.u32 %s3554_s1, 4  ;;  %s1620_s8 = int_to_ptr.vmem [resolvable:$true] %s1619_s8 }
  0x37   : > { %v372_v5 = vld [vmem:[#allocation6 + $0xd8] sm:$0xff]  ;;  %377 = vmatpush.msra.mxu0 %v375_v0  ;;  %442 = vmatpush.msra.mxu1 %v376_v1  ;;  %v369_v6 = vld [vmem:[#allocation6 + $0xc0] sm:$0xff]  ;;  %v370_v7 = vld [vmem:[#allocation6 + $0xc8] sm:$0xff]  ;;  %s1621_s29 = sshll.u32 %s1618_s30, 4  ;;  %s1607_s11 = scalar_lea.sflag [#allocation5], %s2421_s6  ;;  %s1622_s29 = int_to_ptr.hbm [resolvable:$true] %s1621_s29 }
  0x38   : > { %1794 = vmatpush.msra.mxu2 %v373_v2  ;;  %1810 = vmatpush.msra.mxu3 %v374_v3  ;;  %v367_v8 = vld [vmem:[#allocation6 + $0xb0] sm:$0xff]  ;;  %v368_v9 = vld [vmem:[#allocation6 + $0xb8] sm:$0xff]  ;;  %v365_v10 = vld [vmem:[#allocation6 + $0xa0] sm:$0xff]  ;;  %s2186_s14 = sshra.s32 %s1622_s29, 4  ;;  %s2192_s27 = scalar_lea.hbm %s3615_s4, 256  ;;  %s2187_s14 = int_to_ptr.hbm [resolvable:$true] %s2186_s14 }
  0x39   : > { %378 = vmatpush.msra.mxu0 %v373_v2  ;;  %443 = vmatpush.msra.mxu1 %v374_v3  ;;  %v366_v11 = vld [vmem:[#allocation6 + $0xa8] sm:$0xff]  ;;  %v363_v12 = vld [vmem:[#allocation6 + $0x90] sm:$0xff]  ;;  %v364_v13 = vld [vmem:[#allocation6 + $0x98] sm:$0xff]  ;;  %s2188_s18 = scalar_lea.hbm %s2187_s14, 128  ;;  %p2193_p10 = scmp.lt.s32.totalorder %s2187_s14, %s3615_s4 }
  0x3a   : > { %1795 = vmatpush.msra.mxu2 %v371_v4  ;;  %1811 = vmatpush.msra.mxu3 %v372_v5  ;;  %v361_v14 = vld [vmem:[#allocation6 + $0x80] sm:$0xff]  ;;  %v362_v15 = vld [vmem:[#allocation6 + $0x88] sm:$0xff]  ;;  %v359_v16 = vld [vmem:[#allocation6 + $0x70] sm:$0xff]  ;;  %p2189_p1 = scmp.ne.s32.totalorder %s2187_s14, %s2188_s18  ;;  %p2194_p12 = scmp.lt.s32.totalorder %s2192_s27, %s2188_s18 }
  0x3b   : > { %379 = vmatpush.msra.mxu0 %v371_v4  ;;  %444 = vmatpush.msra.mxu1 %v372_v5  ;;  %v360_v17 = vld [vmem:[#allocation6 + $0x78] sm:$0xff]  ;;  %v357_v18 = vld [vmem:[#allocation6 + $0x60] sm:$0xff]  ;;  %v358_v19 = vld [vmem:[#allocation6 + $0x68] sm:$0xff] }
  0x3c   : > { %1796 = vmatpush.msra.mxu2 %v369_v6  ;;  %1812 = vmatpush.msra.mxu3 %v370_v7  ;;  %v355_v20 = vld [vmem:[#allocation6 + $0x50] sm:$0xff]  ;;  %v356_v21 = vld [vmem:[#allocation6 + $0x58] sm:$0xff]  ;;  %v353_v22 = vld [vmem:[#allocation6 + $0x40] sm:$0xff]  ;;  %p2190_p4 = pnand %p2189_p1, %p2390_p3  ;;  %p2195_p13 = por %p2194_p12, %p2193_p10 }
  0x3d   : > { %380 = vmatpush.msra.mxu0 %v369_v6  ;;  %445 = vmatpush.msra.mxu1 %v370_v7  ;;  %v354_v23 = vld [vmem:[#allocation6 + $0x48] sm:$0xff]  ;;  %v351_v24 = vld [vmem:[#allocation6 + $0x30] sm:$0xff]  ;;  %v352_v25 = vld [vmem:[#allocation6 + $0x38] sm:$0xff] }
  0x3e   : > { %1797 = vmatpush.msra.mxu2 %v367_v8  ;;  %1813 = vmatpush.msra.mxu3 %v368_v9  ;;  %v349_v26 = vld [vmem:[#allocation6 + $0x20] sm:$0xff]  ;;  %v350_v27 = vld [vmem:[#allocation6 + $0x28] sm:$0xff]  ;;  %v347_v28 = vld [vmem:[#allocation6 + $0x10] sm:$0xff]  ;;  %p2191_p8 = pneg %p2190_p4 }
  0x3f   : > { %381 = vmatpush.msra.mxu0 %v367_v8  ;;  %446 = vmatpush.msra.mxu1 %v368_v9  ;;  %v348_v29 = vld [vmem:[#allocation6 + $0x18] sm:$0xff]  ;;  %v345_v30 = vld [vmem:[#allocation6] sm:$0xff]  ;;  %v346_v31 = vld [vmem:[#allocation6 + $0x8] sm:$0xff] }
  0x40   : > { %1798 = vmatpush.msra.mxu2 %v365_v10  ;;  %1814 = vmatpush.msra.mxu3 %v366_v11  ;;  %v2442_v32 = vld [vmem:[%s2427_s7 + $0x40] sm:$0xff]  ;;  %v537_v33 = vld [vmem:[#allocation8 + $0xf0] sm:$0xff]  ;;  %v538_v34 = vld [vmem:[#allocation8 + $0xf8] sm:$0xff]  ;;  %p2196_p0 = pnand %p2195_p13, %p2191_p8 }
  0x41   : > { %382 = vmatpush.msra.mxu0 %v365_v10  ;;  %447 = vmatpush.msra.mxu1 %v366_v11  ;;  %v535_v35 = vld [vmem:[#allocation8 + $0xe0] sm:$0xff]  ;;  %v536_v36 = vld [vmem:[#allocation8 + $0xe8] sm:$0xff]  ;;  %v533_v38 = vld [vmem:[#allocation8 + $0xd0] sm:$0xff] }
  0x42   : > { %1799 = vmatpush.msra.mxu2 %v363_v12  ;;  %1815 = vmatpush.msra.mxu3 %v364_v13  ;;  %v2447_v37 = vld [vmem:[%s2427_s7] sm:$0xff]  ;;  %v534_v39 = vld [vmem:[#allocation8 + $0xd8] sm:$0xff]  ;;  %v532_v41 = vld [vmem:[#allocation8 + $0xc8] sm:$0xff] }
  0x43   : > { %383 = vmatpush.msra.mxu0 %v363_v12  ;;  %448 = vmatpush.msra.mxu1 %v364_v13  ;;  %v531_v40 = vld [vmem:[#allocation8 + $0xc0] sm:$0xff]  ;;  %v2452_v42 = vld [vmem:[%s2427_s7 + $0x48] sm:$0xff]  ;;  %v529_v43 = vld [vmem:[#allocation8 + $0xb0] sm:$0xff] }
  0x44   : > { %1800 = vmatpush.msra.mxu2 %v361_v14  ;;  %1816 = vmatpush.msra.mxu3 %v362_v15  ;;  %v530_v44 = vld [vmem:[#allocation8 + $0xb8] sm:$0xff]  ;;  %v527_v45 = vld [vmem:[#allocation8 + $0xa0] sm:$0xff]  ;;  %v528_v46 = vld [vmem:[#allocation8 + $0xa8] sm:$0xff] }
  0x45   : > { %384 = vmatpush.msra.mxu0 %v361_v14  ;;  %449 = vmatpush.msra.mxu1 %v362_v15  ;;  %v2457_v47 = vld [vmem:[%s2427_s7 + $0x8] sm:$0xff]  ;;  %v525_v48 = vld [vmem:[#allocation8 + $0x90] sm:$0xff]  ;;  %v526_v49 = vld [vmem:[#allocation8 + $0x98] sm:$0xff] }
  0x46   : > { %1801 = vmatpush.msra.mxu2 %v359_v16  ;;  %1817 = vmatpush.msra.mxu3 %v360_v17  ;;  %v523_v50 = vld [vmem:[#allocation8 + $0x80] sm:$0xff]  ;;  %v524_v51 = vld [vmem:[#allocation8 + $0x88] sm:$0xff]  ;;  %v2462_v52 = vld [vmem:[%s2427_s7 + $0x50] sm:$0xff] }
  0x47   : > { %385 = vmatpush.msra.mxu0 %v359_v16  ;;  %450 = vmatpush.msra.mxu1 %v360_v17  ;;  %v521_v53 = vld [vmem:[#allocation8 + $0x70] sm:$0xff]  ;;  %v522_v54 = vld [vmem:[#allocation8 + $0x78] sm:$0xff]  ;;  %v519_v55 = vld [vmem:[#allocation8 + $0x60] sm:$0xff] }
  0x48   : > { %1802 = vmatpush.msra.mxu2 %v357_v18  ;;  %1818 = vmatpush.msra.mxu3 %v358_v19  ;;  %v520_v56 = vld [vmem:[#allocation8 + $0x68] sm:$0xff]  ;;  %v2467_v57 = vld [vmem:[%s2427_s7 + $0x10] sm:$0xff]  ;;  %v518_v59 = vld [vmem:[#allocation8 + $0x58] sm:$0xff] }
  0x49   : > { %386 = vmatpush.msra.mxu0 %v357_v18  ;;  %451 = vmatpush.msra.mxu1 %v358_v19  ;;  %v517_v58 = vld [vmem:[#allocation8 + $0x50] sm:$0xff]  ;;  %v515_v60 = vld [vmem:[#allocation8 + $0x40] sm:$0xff]  ;;  %v516_v61 = vld [vmem:[#allocation8 + $0x48] sm:$0xff] }
  0x4a   : > { %1803 = vmatpush.msra.mxu2 %v355_v20  ;;  %1819 = vmatpush.msra.mxu3 %v356_v21  ;;  %v2472_v62 = vld [vmem:[%s2427_s7 + $0x58] sm:$0xff]  ;;  %v513_v63 = vld [vmem:[#allocation8 + $0x30] sm:$0xff]  ;;  %v511_v1 = vld [vmem:[#allocation8 + $0x20] sm:$0xff] }
  0x4b   : > { %387 = vmatpush.msra.mxu0 %v355_v20  ;;  %452 = vmatpush.msra.mxu1 %v356_v21  ;;  %v514_v0 = vld [vmem:[#allocation8 + $0x38] sm:$0xff]  ;;  %v512_v2 = vld [vmem:[#allocation8 + $0x28] sm:$0xff]  ;;  %v509_v4 = vld [vmem:[#allocation8 + $0x10] sm:$0xff] }
  0x4c   : > { %1804 = vmatpush.msra.mxu2 %v353_v22  ;;  %1820 = vmatpush.msra.mxu3 %v354_v23  ;;  %v332_v3 = vld [vmem:[%s2427_s7 + $0x18] sm:$0xff]  ;;  %v507_v6 = vld [vmem:[#allocation8] sm:$0xff]  ;;  %v508_v7 = vld [vmem:[#allocation8 + $0x8] sm:$0xff] }
  0x4d   : > { %388 = vmatpush.msra.mxu0 %v353_v22  ;;  %453 = vmatpush.msra.mxu1 %v354_v23  ;;  %v510_v5 = vld [vmem:[#allocation8 + $0x18] sm:$0xff]  ;;  %v2478_v8 = vld [vmem:[%s2427_s7 + $0x60] sm:$0xff]  ;;  %v2484_v10 = vld [vmem:[%s2427_s7 + $0x68] sm:$0xff] }
  0x4e   : > { %1805 = vmatpush.msra.mxu2 %v351_v24  ;;  %1821 = vmatpush.msra.mxu3 %v352_v25  ;;  %v333_v9 = vld [vmem:[%s2427_s7 + $0x20] sm:$0xff]  ;;  %v334_v11 = vld [vmem:[%s2427_s7 + $0x28] sm:$0xff]  ;;  %v2490_v12 = vld [vmem:[%s2427_s7 + $0x70] sm:$0xff] }
  0x4f   : > { %389 = vmatpush.msra.mxu0 %v351_v24  ;;  %454 = vmatpush.msra.mxu1 %v352_v25  ;;  %v335_v13 = vld [vmem:[%s2427_s7 + $0x30] sm:$0xff]  ;;  %v2496_v14 = vld [vmem:[%s2427_s7 + $0x78] sm:$0xff]  ;;  %v1354_v22 = vld [vmem:[#allocation9 + $0x68] sm:$0xff] }
  0x50   : > { %1806 = vmatpush.msra.mxu2 %v349_v26  ;;  %1822 = vmatpush.msra.mxu3 %v350_v27  ;;  %v336_v15 = vld [vmem:[%s2427_s7 + $0x38] sm:$0xff]  ;;  %v1355_v18 = vld [vmem:[#allocation9 + $0x70] sm:$0xff]  ;;  %v1370_v23 = vld [vmem:[#allocation9 + $0xe8] sm:$0xff] }
  0x51   : > { %390 = vmatpush.msra.mxu0 %v349_v26  ;;  %455 = vmatpush.msra.mxu1 %v350_v27  ;;  %v1356_v16 = vld [vmem:[#allocation9 + $0x78] sm:$0xff]  ;;  %v1371_v19 = vld [vmem:[#allocation9 + $0xf0] sm:$0xff]  ;;  %v1353_v24 = vld [vmem:[#allocation9 + $0x60] sm:$0xff] }
  0x52   : > { %1807 = vmatpush.msra.mxu2 %v347_v28  ;;  %1823 = vmatpush.msra.mxu3 %v348_v29  ;;  %v1372_v17 = vld [vmem:[#allocation9 + $0xf8] sm:$0xff]  ;;  %v1369_v25 = vld [vmem:[#allocation9 + $0xe0] sm:$0xff] }
  0x53   : > { %391 = vmatpush.msra.mxu0 %v347_v28  ;;  %456 = vmatpush.msra.mxu1 %v348_v29  ;;  %v1352_v28 = vld [vmem:[#allocation9 + $0x58] sm:$0xff] }
  0x54   : > { %1808 = vmatpush.msra.mxu2 %v345_v30  ;;  %1824 = vmatpush.msra.mxu3 %v346_v31  ;;  %v1368_v29 = vld [vmem:[#allocation9 + $0xd8] sm:$0xff] }
  0x55   : > { %417 = vmatmul.f32.vlgmr.msra.gmra.mxu2 %v2442_v32  ;;  %482 = vmatmul.f32.vlgmr.msra.gmra.mxu3 %v2442_v32 }
  0x56   : > { %539 = vmatpush.msrb.mxu2 %v537_v33  ;;  %604 = vmatpush.msrb.mxu3 %v538_v34  ;;  %v1350_v34 = vld [vmem:[#allocation9 + $0x48] sm:$0xff] }
  0x57   : > { %392 = vmatpush.msra.mxu0 %v345_v30  ;;  %457 = vmatpush.msra.mxu1 %v346_v31  ;;  %v1351_v30 = vld [vmem:[#allocation9 + $0x50] sm:$0xff] }
  0x58   : > { %540 = vmatpush.msrb.mxu2 %v535_v35  ;;  %605 = vmatpush.msrb.mxu3 %v536_v36  ;;  %v1367_v31 = vld [vmem:[#allocation9 + $0xd0] sm:$0xff]  ;;  %v1366_v35 = vld [vmem:[#allocation9 + $0xc8] sm:$0xff] }
  0x59   : > { %393 = vmatmul.f32.vlgmr.msra.gmra.mxu0 %v2447_v37  ;;  %458 = vmatmul.f32.vlgmr.msra.gmra.mxu1 %v2447_v37 }
  0x5a   : > { %541 = vmatpush.msrb.mxu2 %v533_v38  ;;  %606 = vmatpush.msrb.mxu3 %v534_v39  ;;  %v1349_v38 = vld [vmem:[#allocation9 + $0x40] sm:$0xff] }
  0x5b   : > { %1373 = vmatpush.msrb.mxu0 %v1356_v16  ;;  %1438 = vmatpush.msrb.mxu1 %v1372_v17  ;;  %v1365_v39 = vld [vmem:[#allocation9 + $0xc0] sm:$0xff] }
  0x5c   : > { %542 = vmatpush.msrb.mxu2 %v531_v40  ;;  %607 = vmatpush.msrb.mxu3 %v532_v41 }
  0x5d   : > { %420 = vmatmul.f32.gmra.mxu2 %v2452_v42  ;;  %485 = vmatmul.f32.gmra.mxu3 %v2452_v42 }
  0x5e   : > { %543 = vmatpush.msrb.mxu2 %v529_v43  ;;  %608 = vmatpush.msrb.mxu3 %v530_v44 }
  0x5f   : > { %1374 = vmatpush.msrb.mxu0 %v1355_v18  ;;  %1439 = vmatpush.msrb.mxu1 %v1371_v19  ;;  %v1344_v18 = vld [vmem:[#allocation9 + $0x18] sm:$0xff] }
  0x60   : > { %544 = vmatpush.msrb.mxu2 %v527_v45  ;;  %609 = vmatpush.msrb.mxu3 %v528_v46  ;;  %v1348_v46 = vld [vmem:[#allocation9 + $0x38] sm:$0xff] }
  0x61   : > { %396 = vmatmul.f32.gmra.mxu0 %v2457_v47  ;;  %461 = vmatmul.f32.gmra.mxu1 %v2457_v47  ;;  %v1360_v19 = vld [vmem:[#allocation9 + $0x98] sm:$0xff] }
  0x62   : > { %545 = vmatpush.msrb.mxu2 %v525_v48  ;;  %610 = vmatpush.msrb.mxu3 %v526_v49 }
  0x63   : > { %1375 = vmatpush.msrb.mxu0 %v1354_v22  ;;  %1440 = vmatpush.msrb.mxu1 %v1370_v23 }
  0x64   : > { %546 = vmatpush.msrb.mxu2 %v523_v50  ;;  %611 = vmatpush.msrb.mxu3 %v524_v51  ;;  %v1347_v50 = vld [vmem:[#allocation9 + $0x30] sm:$0xff] }
  0x65   : > { %423 = vmatmul.f32.gmra.mxu2 %v2462_v52  ;;  %488 = vmatmul.f32.gmra.mxu3 %v2462_v52  ;;  %v1363_v51 = vld [vmem:[#allocation9 + $0xb0] sm:$0xff] }
  0x66   : > { %547 = vmatpush.msrb.mxu2 %v521_v53  ;;  %612 = vmatpush.msrb.mxu3 %v522_v54 }
  0x67   : > { %1376 = vmatpush.msrb.mxu0 %v1353_v24  ;;  %1441 = vmatpush.msrb.mxu1 %v1369_v25 }
  0x68   : > { %548 = vmatpush.msrb.mxu2 %v519_v55  ;;  %613 = vmatpush.msrb.mxu3 %v520_v56  ;;  %v1346_v56 = vld [vmem:[#allocation9 + $0x28] sm:$0xff] }
  0x69   : > { %399 = vmatmul.f32.gmra.mxu0 %v2467_v57  ;;  %464 = vmatmul.f32.gmra.mxu1 %v2467_v57 }
  0x6a   : > { %549 = vmatpush.msrb.mxu2 %v517_v58  ;;  %614 = vmatpush.msrb.mxu3 %v518_v59 }
  0x6b   : > { %1377 = vmatpush.msrb.mxu0 %v1352_v28  ;;  %1442 = vmatpush.msrb.mxu1 %v1368_v29  ;;  %v1343_v29 = vld [vmem:[#allocation9 + $0x10] sm:$0xff] }
  0x6c   : > { %550 = vmatpush.msrb.mxu2 %v515_v60  ;;  %615 = vmatpush.msrb.mxu3 %v516_v61 }
  0x6d   : > { %426 = vmatmul.f32.gmra.mxu2 %v2472_v62  ;;  %491 = vmatmul.f32.gmra.mxu3 %v2472_v62 }
  0x6e   : > { %551 = vmatpush.msrb.mxu2 %v513_v63  ;;  %616 = vmatpush.msrb.mxu3 %v514_v0  ;;  %v1345_v0 = vld [vmem:[#allocation9 + $0x20] sm:$0xff] }
  0x6f   : > { %1378 = vmatpush.msrb.mxu0 %v1351_v30  ;;  %1443 = vmatpush.msrb.mxu1 %v1367_v31  ;;  %v1359_v30 = vld [vmem:[#allocation9 + $0x90] sm:$0xff] }
  0x70   : > { %552 = vmatpush.msrb.mxu2 %v511_v1  ;;  %617 = vmatpush.msrb.mxu3 %v512_v2  ;;  %v1361_v1 = vld [vmem:[#allocation9 + $0xa0] sm:$0xff] }
  0x71   : > { %402 = vmatmul.f32.gmra.mxu0 %v332_v3  ;;  %467 = vmatmul.f32.gmra.mxu1 %v332_v3 }
  0x72   : > { %553 = vmatpush.msrb.mxu2 %v509_v4  ;;  %618 = vmatpush.msrb.mxu3 %v510_v5 }
  0x73   : > { %1379 = vmatpush.msrb.mxu0 %v1350_v34  ;;  %1444 = vmatpush.msrb.mxu1 %v1366_v35 }
  0x74   : > { %554 = vmatpush.msrb.mxu2 %v507_v6  ;;  %619 = vmatpush.msrb.mxu3 %v508_v7 }
  0x75   : > { %429 = vmatmul.f32.gmra.mxu2 %v2478_v8  ;;  %494 = vmatmul.f32.gmra.mxu3 %v2478_v8 }
  0x76   : > { %1380 = vmatpush.msrb.mxu0 %v1349_v38  ;;  %1445 = vmatpush.msrb.mxu1 %v1365_v39 }
  0x78   : > { %1381 = vmatpush.msrb.mxu0 %v1348_v46 }
  0x79   : > { %405 = vmatmul.f32.gmra.mxu0 %v333_v9  ;;  %470 = vmatmul.f32.gmra.mxu1 %v333_v9 }
  0x7a   : > { %1382 = vmatpush.msrb.mxu0 %v1347_v50 }
  0x7c   : > { %1383 = vmatpush.msrb.mxu0 %v1346_v56 }
  0x7d   : > { %432 = vmatmul.f32.gmra.mxu2 %v2484_v10  ;;  %497 = vmatmul.f32.gmra.mxu3 %v2484_v10 }
  0x7e   : > { %1384 = vmatpush.msrb.mxu0 %v1345_v0 }
  0x80   : > { %1385 = vmatpush.msrb.mxu0 %v1344_v18 }
  0x81   : > { %408 = vmatmul.f32.gmra.mxu0 %v334_v11  ;;  %473 = vmatmul.f32.gmra.mxu1 %v334_v11 }
  0x82   : > { %1386 = vmatpush.msrb.mxu0 %v1343_v29 }
  0x85   : > { %435 = vmatmul.f32.gmra.mxu2 %v2490_v12  ;;  %500 = vmatmul.f32.gmra.mxu3 %v2490_v12 }
  0x89   : > { %411 = vmatmul.f32.gmra.mxu0 %v335_v13  ;;  %476 = vmatmul.f32.gmra.mxu1 %v335_v13 }
  0x8d   : > { %438 = vmatmul.f32.gmra.mxu2 %v2496_v14  ;;  %503 = vmatmul.f32.gmra.mxu3 %v2496_v14 }
  0x91   : > { %414 = vmatmul.f32.gmra.mxu0 %v336_v15  ;;  %479 = vmatmul.f32.gmra.mxu1 %v336_v15 }
  0x95   : > { %555 = vmatmul.f32.vlgmr.msrb.gmra.mxu2 %v2447_v37  ;;  %620 = vmatmul.f32.vlgmr.msrb.gmra.mxu3 %v2447_v37 }
  0x9d   : > { %558 = vmatmul.f32.gmra.mxu2 %v2457_v47  ;;  %623 = vmatmul.f32.gmra.mxu3 %v2457_v47  ;;  %v1364_v47 = vld [vmem:[#allocation9 + $0xb8] sm:$0xff] }
  0x9e   : > { %1446 = vmatpush.msrb.mxu1 %v1364_v47 }
  0xa0   : > { %1447 = vmatpush.msrb.mxu1 %v1363_v51 }
  0xa5   : > { %561 = vmatmul.f32.gmra.mxu2 %v2467_v57  ;;  %626 = vmatmul.f32.gmra.mxu3 %v2467_v57  ;;  %v1362_v57 = vld [vmem:[#allocation9 + $0xa8] sm:$0xff] }
  0xa6   : > { %1448 = vmatpush.msrb.mxu1 %v1362_v57 }
  0xa8   : > { %1449 = vmatpush.msrb.mxu1 %v1361_v1 }
  0xaa   : > { %1450 = vmatpush.msrb.mxu1 %v1360_v19 }
  0xac   : > { %1451 = vmatpush.msrb.mxu1 %v1359_v30 }
  0xad   : > { %564 = vmatmul.f32.gmra.mxu2 %v332_v3  ;;  %629 = vmatmul.f32.gmra.mxu3 %v332_v3 }
  0xb5   : > { %567 = vmatmul.f32.gmra.mxu2 %v333_v9  ;;  %632 = vmatmul.f32.gmra.mxu3 %v333_v9 }
  0xbd   : > { %570 = vmatmul.f32.gmra.mxu2 %v334_v11  ;;  %635 = vmatmul.f32.gmra.mxu3 %v334_v11 }
  0xc5   : > { %573 = vmatmul.f32.gmra.mxu2 %v335_v13  ;;  %638 = vmatmul.f32.gmra.mxu3 %v335_v13 }
  0xcd   : > { %576 = vmatmul.f32.gmra.mxu2 %v336_v15  ;;  %641 = vmatmul.f32.gmra.mxu3 %v336_v15 }
  0xd5   : > { %579 = vmatmul.f32.gmra.mxu2 %v2442_v32  ;;  %644 = vmatmul.f32.gmra.mxu3 %v2442_v32 }
  0xd6   : > { %v2535_v40 = vpop.f32.mrf.mxu0  ;;  %v2537_v41 = vpop.f32.mrf.mxu1 }
  0xd7   : > { %v1754_v44 = vmul.f32 -1.442695, %v2535_v40  ;;  %v1755_v48 = vmul.f32 -1.442695, %v2537_v41 }
  0xd8   : > { %v2511_v20 = vpop.f32.mrf.mxu2  ;;  %v2513_v21 = vpop.f32.mrf.mxu3 }
  0xd9   : > { %3645 = vst [vmem:[#allocation16_spill] sm:$0xff] %v2511_v20  ;;  %1924 = vpow2.f32 %v1754_v44  ;;  %v1770_v3 = vmul.f32 -1.442695, %v2511_v20  ;;  %v1771_v5 = vmul.f32 -1.442695, %v2513_v21 }
  0xda   : > { %3646 = vst [vmem:[#allocation17_spill] sm:$0xff] %v2513_v21  ;;  %1926 = vpow2.f32 %v1755_v48 }
  0xdd   : > { %582 = vmatmul.f32.gmra.mxu2 %v2452_v42  ;;  %647 = vmatmul.f32.gmra.mxu3 %v2452_v42 }
  0xde   : > { %v2546_v45 = vpop.f32.mrf.mxu0  ;;  %v2551_v49 = vpop.f32.mrf.mxu1 }
  0xdf   : > { %v1757_v53 = vmul.f32 -1.442695, %v2551_v49  ;;  %v1925_v58 = vpop.eup %1924 }
  0xe0   : > { %v2519_v26 = vpop.f32.mrf.mxu2  ;;  %v2521_v27 = vpop.f32.mrf.mxu3 }
  0xe1   : > { %3647 = vst [vmem:[#allocation18_spill] sm:$0xff] %v2519_v26  ;;  %v1927_v60 = vpop.eup %1926  ;;  %v1772_v48 = vmul.f32 -1.442695, %v2519_v26 }
  0xe2   : > { %3648 = vst [vmem:[#allocation19_spill] sm:$0xff] %v2521_v27  ;;  %v2565_v63 = vadd.f32 1.0, %v1927_v60 }
  0xe4   : > { %vm817_vm1 = vweird.f32 %v2565_v63 }
  0xe5   : > { %585 = vmatmul.f32.gmra.mxu2 %v2462_v52  ;;  %650 = vmatmul.f32.gmra.mxu3 %v2462_v52  ;;  %v1756_v52 = vmul.f32 -1.442695, %v2546_v45 }
  0xe6   : > { %v2559_v59 = vpop.f32.mrf.mxu0  ;;  %v2561_v61 = vpop.f32.mrf.mxu1 }
  0xe7   : > { %1928 = vpow2.f32 %v1756_v52  ;;  %v1758_v6 = vmul.f32 -1.442695, %v2559_v59  ;;  %v1759_v13 = vmul.f32 -1.442695, %v2561_v61 }
  0xe8   : > { %v2525_v32 = vpop.f32.mrf.mxu2  ;;  %v2527_v33 = vpop.f32.mrf.mxu3  ;;  %1930 = vpow2.f32 %v1757_v53  ;;  %v2616_v53 = vmul.f32 -1.442695, %v2521_v27 }
  0xe9   : > { %3649 = vst [vmem:[#allocation20_spill] sm:$0xff] %v2525_v32 }
  0xed   : > { %588 = vmatmul.f32.gmra.mxu2 %v2472_v62  ;;  %653 = vmatmul.f32.gmra.mxu3 %v2472_v62  ;;  %v2563_v62 = vadd.f32 1.0, %v1925_v58  ;;  %v1929_v2 = vpop.eup %1928 }
  0xee   : > { %v1931_v4 = vpop.eup %1930  ;;  %v2576_v9 = vadd.f32 1.0, %v1929_v2  ;;  %v2580_v11 = vpop.f32.mrf.mxu0 }
  0xef   : > { %1932 = vrcp.f32 %v2563_v62  ;;  %v1760_v24 = vmul.f32 -1.442695, %v2580_v11  ;;  %vm802_vm0 = vweird.f32 %v2563_v62  ;;  %v806_v58 = vand.u32 2147483647, %v2563_v62 }
  0xf0   : > { %v2531_v36 = vpop.f32.mrf.mxu2  ;;  %v2533_v37 = vpop.f32.mrf.mxu3  ;;  %1934 = vrcp.f32 %v2565_v63  ;;  %v808_v60 = vand.u32 2147483648, %v2563_v62  ;;  %vm832_vm8 = vweird.f32 %v2576_v9 }
  0xf1   : > { %1936 = vpow2.f32 %v1770_v3  ;;  %vm2643_vm4 = vcmp.eq.f32.partialorder %v806_v58, 8.507059e+37 }
  0xf2   : > { %1938 = vpow2.f32 %v1771_v5 }
  0xf3   : > { %1940 = vpow2.f32 %v1758_v6  ;;  %v1342_v6 = vld [vmem:[#allocation9 + $0x8] sm:$0xff] }
  0xf4   : > { %1942 = vrcp.f32 %v2576_v9  ;;  %1387 = vmatpush.msrb.mxu0 %v1342_v6 }
  0xf5   : > { %591 = vmatmul.f32.gmra.mxu2 %v2478_v8  ;;  %656 = vmatmul.f32.gmra.mxu3 %v2478_v8 }
  0xf6   : > { %v2607_v46 = vpop.f32.mrf.mxu0 }
  0xf7   : > { %v1762_v18 = vmul.f32 -1.442695, %v2607_v46 }
  0xf8   : > { %v2541_v42 = vpop.f32.mrf.mxu2  ;;  %v2543_v43 = vpop.f32.mrf.mxu3 }
  0xfd   : > { %594 = vmatmul.f32.gmra.mxu2 %v2484_v10  ;;  %659 = vmatmul.f32.gmra.mxu3 %v2484_v10  ;;  %v2578_v10 = vadd.f32 1.0, %v1931_v4  ;;  %v821_v4 = vand.u32 2147483647, %v2565_v63 }
  0xfe   : > { %v2678_v6 = vpop.f32.mrf.mxu0 }
  0xff   : > { %1944 = vrcp.f32 %v2578_v10  ;;  %vm2660_vm6 = vcmp.eq.f32.partialorder %v821_v4, 8.507059e+37  ;;  %vm847_vm10 = vweird.f32 %v2578_v10 }
 0x100   : > { %v2555_v54 = vpop.f32.mrf.mxu2  ;;  %v2557_v55 = vpop.f32.mrf.mxu3  ;;  %1946 = vpow2.f32 %v1759_v13  ;;  %v1358_v13 = vld [vmem:[#allocation9 + $0x88] sm:$0xff] }
 0x101   : > { %3650 = vst [vmem:[#allocation21_spill] sm:$0xff] %v2555_v54  ;;  %1948 = vpow2.f32 %v1760_v24  ;;  %1452 = vmatpush.msrb.mxu1 %v1358_v13  ;;  %v1775_v54 = vmul.f32 -1.442695, %v2527_v33 }
 0x102   : > { %3651 = vst [vmem:[#allocation22_spill] sm:$0xff] %v2557_v55 }
 0x105   : > { %597 = vmatmul.f32.gmra.mxu2 %v2490_v12  ;;  %662 = vmatmul.f32.gmra.mxu3 %v2490_v12  ;;  %v2582_v12 = vpop.f32.mrf.mxu1 }
 0x106   : > { %v1761_v28 = vmul.f32 -1.442695, %v2582_v12 }
 0x108   : > { %v2572_v7 = vpop.f32.mrf.mxu2  ;;  %v2574_v8 = vpop.f32.mrf.mxu3  ;;  %1950 = vpow2.f32 %v1761_v28 }
 0x109   : > { %3652 = vst [vmem:[#allocation23_spill] sm:$0xff] %v2572_v7 }
 0x10a   : > { %3653 = vst [vmem:[#allocation24_spill] sm:$0xff] %v2574_v8 }
 0x10d   : > { %600 = vmatmul.f32.gmra.mxu2 %v2496_v14  ;;  %665 = vmatmul.f32.gmra.mxu3 %v2496_v14  ;;  %v2585_v14 = vpop.eup %1932  ;;  %v2612_v51 = vpop.f32.mrf.mxu1 }
 0x10e   : > { %v2588_v15 = vpop.eup %1934  ;;  %v798_v17 = vmul.f32 %v2585_v14, %v2563_v62  ;;  %vm803_vm2 = vweird.f32 %v2585_v14  ;;  %v1764_v62 = vmul.f32 -1.442695, %v2678_v6 }
 0x10f   : > { %v1937_v16 = vpop.eup %1936  ;;  %v813_v23 = vmul.f32 %v2588_v15, %v2565_v63  ;;  %vm818_vm3 = vweird.f32 %v2588_v15  ;;  %vm2655_vm5 = vmor %vm802_vm0, %vm803_vm2 }
 0x110   : > { %v1939_v22 = vpop.eup %1938  ;;  %v2597_v31 = vpop.f32.mrf.mxu2  ;;  %v2605_v39 = vadd.f32 1.0, %v1937_v16  ;;  %v799_v44 = vsub.f32 1.0, %v798_v17  ;;  %v823_v16 = vand.u32 2147483648, %v2565_v63  ;;  %vm2671_vm7 = vmor %vm817_vm1, %vm818_vm3 }
 0x111   : > { %v1941_v25 = vpop.eup %1940  ;;  %3654 = vst [vmem:[#allocation25_spill] sm:$0xff] %v2597_v31  ;;  %v2599_v34 = vpop.f32.mrf.mxu3  ;;  %v814_v47 = vsub.f32 1.0, %v813_v23  ;;  %v2620_v57 = vadd.f32 1.0, %v1939_v22  ;;  %v1763_v23 = vmul.f32 -1.442695, %v2612_v51 }
 0x112   : > { %3655 = vst [vmem:[#allocation26_spill] sm:$0xff] %v2599_v34  ;;  %v2601_v35 = vpop.eup %1942  ;;  %v2610_v50 = vadd.f32 1.0, %v1941_v25  ;;  %1952 = vrcp.f32 %v2605_v39  ;;  %v800_v2 = vmul.f32 %v2585_v14, %v799_v44 }
 0x113   : > { %v2603_v38 = vpop.eup %1944  ;;  %v828_v56 = vmul.f32 %v2601_v35, %v2576_v9  ;;  %v815_v3 = vmul.f32 %v2588_v15, %v814_v47  ;;  %vm833_vm9 = vweird.f32 %v2601_v35 }
 0x114   : > { %v1947_v52 = vpop.eup %1946  ;;  %v843_v0 = vmul.f32 %v2603_v38, %v2578_v10  ;;  %1954 = vrcp.f32 %v2610_v50  ;;  %v801_v28 = vadd.f32 %v2585_v14, %v800_v2  ;;  %vm848_vm11 = vweird.f32 %v2603_v38  ;;  %vm2714_vm12 = vmor %vm832_vm8, %vm833_vm9 }
 0x115   : > { %v2633_v5 = vadd.f32 1.0, %v1947_v52  ;;  %v829_v17 = vsub.f32 1.0, %v828_v56  ;;  %v1949_v19 = vpop.eup %1948  ;;  %1956 = vrcp.f32 %v2620_v57  ;;  %v809_v52 = vor.u32 1.1754944e-38, %v808_v60  ;;  %v2686_v25 = vpop.f32.mrf.mxu1  ;;  %vm2731_vm14 = vmor %vm847_vm10, %vm848_vm11 }
 0x116   : > { %v844_v22 = vsub.f32 1.0, %v843_v0  ;;  %v1951_v24 = vpop.eup %1950  ;;  %1958 = vpow2.f32 %v1772_v48  ;;  %v816_v56 = vadd.f32 %v2588_v15, %v815_v3  ;;  %v1341_v48 = vld [vmem:[#allocation9] sm:$0xff]  ;;  %v824_v60 = vor.u32 1.1754944e-38, %v823_v16 }
 0x117   : > { %1960 = vrcp.f32 %v2633_v5  ;;  %v1357_v0 = vld [vmem:[#allocation9 + $0x80] sm:$0xff]  ;;  %v830_v3 = vmul.f32 %v2601_v35, %v829_v17  ;;  %v2676_v4 = vadd.f32 1.0, %v1949_v19  ;;  %1388 = vmatpush.msrb.mxu0 %v1341_v48  ;;  %v2684_v1 = vadd.f32 1.0, %v1951_v24 }
 0x118   : > { %v2647_v30 = vpop.f32.mrf.mxu2  ;;  %v2665_v2 = vpop.eup %1952  ;;  %1962 = vpow2.f32 %v1762_v18  ;;  %1453 = vmatpush.msrb.mxu1 %v1357_v0  ;;  %v845_v63 = vmul.f32 %v2603_v38, %v844_v22  ;;  %v805_v16 = vsel %vm2655_vm5, %v2585_v14, %v801_v28  ;;  %v836_v17 = vand.u32 2147483647, %v2576_v9 }
 0x119   : > { %v2649_v44 = vpop.f32.mrf.mxu3  ;;  %1964 = vpow2.f32 %v1763_v23  ;;  %v838_v18 = vand.u32 2147483648, %v2576_v9  ;;  %v820_v22 = vsel %vm2671_vm7, %v2588_v15, %v816_v56  ;;  %v851_v23 = vand.u32 2147483647, %v2578_v10 }
 0x11a   : > { %v2680_v13 = vpop.eup %1954  ;;  %v831_v14 = vadd.f32 %v2601_v35, %v830_v3  ;;  %v853_v28 = vand.u32 2147483648, %v2578_v10  ;;  %1966 = vrcp.f32 %v2676_v4  ;;  %v846_v0 = vadd.f32 %v2603_v38, %v845_v63 }
 0x11b   : > { %v2694_v19 = vpop.eup %1956  ;;  %v858_v47 = vmul.f32 %v2680_v13, %v2610_v50  ;;  %1968 = vrcp.f32 %v2684_v1  ;;  %vm2723_vm13 = vcmp.eq.f32.partialorder %v836_v17, 8.507059e+37  ;;  %v1765_v63 = vmul.f32 -1.442695, %v2686_v25 }
 0x11c   : > { %v1959_v24 = vpop.eup %1958  ;;  %1970 = vpow2.f32 %v2616_v53  ;;  %v810_v53 = vsel %vm2643_vm4, %v809_v52, %v805_v16  ;;  %v825_v17 = vsel %vm2660_vm6, %v824_v60, %v820_v22  ;;  %v839_v26 = vor.u32 1.1754944e-38, %v838_v18 }
 0x11d   : > { %v2707_v48 = vpop.eup %1960  ;;  %v1774_v10 = vmul.f32 -1.442695, %v2525_v32  ;;  %v835_v8 = vsel %vm2714_vm12, %v2601_v35, %v831_v14  ;;  %vm2748_vm15 = vcmp.eq.f32.partialorder %v851_v23, 8.507059e+37  ;;  %v854_v21 = vor.u32 1.1754944e-38, %v853_v28  ;;  %v2782_v56 = vpop.f32.mrf.mxu1 }
 0x11e   : > { %v1963_v3 = vpop.eup %1962  ;;  %v859_v20 = vsub.f32 1.0, %v858_v47  ;;  %v850_v29 = vsel %vm2731_vm14, %v2603_v38, %v846_v0  ;;  %v873_v52 = vmul.f32 %v2707_v48, %v2633_v5  ;;  %1972 = vpow2.f32 %v1764_v62  ;;  %v2771_v38 = vpop.f32.mrf.mxu0 }
 0x11f   : > { %v1965_v34 = vpop.eup %1964  ;;  %v2757_v58 = vadd.f32 1.0, %v1963_v3  ;;  %v2763_v35 = vmul.f32 %v2665_v2, %v2605_v39  ;;  %v3672_v16 = vand.u32 2147483648, %v2605_v39  ;;  %1974 = vpow2.f32 %v1765_v63 }
 0x120   : > { %v2736_v31 = vpop.f32.mrf.mxu2  ;;  %v2759_v60 = vpop.eup %1966  ;;  %v2769_v22 = vadd.f32 1.0, %v1965_v34  ;;  %v2777_v14 = vmul.f32 %v2694_v19, %v2620_v57  ;;  %v1277_v28 = vmul.f32 %v810_v53, %v2535_v40  ;;  %v2780_v47 = vadd.f32 1.0, %v1959_v24 }
 0x121   : > { %v2738_v27 = vpop.f32.mrf.mxu3  ;;  %v2767_v18 = vor.u32 1.1754944e-38, %v3672_v16  ;;  %v2773_v23 = vpop.eup %1968  ;;  %1976 = vpow2.f32 %v1774_v10  ;;  %v1278_v34 = vmul.f32 %v825_v17, %v2537_v41  ;;  %v840_v62 = vsel %vm2723_vm13, %v839_v26, %v835_v8 }
 0x122   : > { %v2784_v0 = vpop.eup %1970  ;;  %v855_v3 = vsel %vm2748_vm15, %v854_v21, %v850_v29  ;;  %v860_v9 = vmul.f32 %v2680_v13, %v859_v20  ;;  %v874_v63 = vsub.f32 1.0, %v873_v52  ;;  %v888_v40 = vmul.f32 %v2759_v60, %v2676_v4 }
 0x123   : > { %3673 = vst [vmem:[#allocation27_spill] sm:$0xff] %v2767_v18  ;;  %1978 = vrcp.f32 %v2757_v58  ;;  %v1309_v24 = vmul.f32 %v1277_v28, %v2647_v30  ;;  %v903_v53 = vmul.f32 %v2773_v23, %v2684_v1  ;;  %v1766_v26 = vmul.f32 -1.442695, %v2771_v38 }
 0x124   : > { %1980 = vrcp.f32 %v2769_v22  ;;  %v1310_v41 = vmul.f32 %v1278_v34, %v2649_v44  ;;  %v1973_v7 = vpop.eup %1972  ;;  %vm862_vm0 = vweird.f32 %v2610_v50  ;;  %vm863_vm1 = vweird.f32 %v2680_v13 }
 0x125   : > { %1982 = vrcp.f32 %v2780_v47  ;;  %v1767_v8 = vmul.f32 -1.442695, %v2782_v56  ;;  %1389 = vmatmul.f32.vlgmr.msrb.gmra.mxu0 %v1309_v24  ;;  %v1975_v30 = vpop.eup %1974  ;;  %v1279_v15 = vmul.f32 %v840_v62, %v2546_v45  ;;  %v866_v17 = vand.u32 2147483647, %v2610_v50  ;;  %vm2821_vm3 = vmor %vm862_vm0, %vm863_vm1 }
 0x126   : > { %v868_v44 = vand.u32 2147483648, %v2610_v50  ;;  %v881_v10 = vand.u32 2147483647, %v2633_v5  ;;  %1454 = vmatmul.f32.vlgmr.msrb.gmra.mxu1 %v1310_v41  ;;  %v1280_v52 = vmul.f32 %v855_v3, %v2551_v49  ;;  %v861_v16 = vadd.f32 %v2680_v13, %v860_v9 }
 0x127   : > { %v2813_v29 = vpop.eup %1976  ;;  %v875_v28 = vmul.f32 %v2707_v48, %v874_v63  ;;  %vm877_vm2 = vweird.f32 %v2633_v5  ;;  %v889_v34 = vsub.f32 1.0, %v888_v40  ;;  %v904_v62 = vsub.f32 1.0, %v903_v53 }
 0x128   : > { %v2801_v21 = vpop.f32.mrf.mxu2  ;;  %v2825_v24 = vadd.f32 1.0, %v1973_v7  ;;  %1984 = vpow2.f32 %v1766_v26  ;;  %vm878_vm4 = vweird.f32 %v2707_v48  ;;  %v2830_v49 = vadd.f32 1.0, %v1975_v30  ;;  %v2844_v26 = vpop.f32.mrf.mxu0 }
 0x129   : > { %v2803_v20 = vpop.f32.mrf.mxu3  ;;  %v2827_v41 = vpop.eup %1978  ;;  %1986 = vpow2.f32 %v1767_v8  ;;  %v1311_v3 = vmul.f32 %v1279_v15, %v2736_v31  ;;  %vm2835_vm5 = vcmp.eq.f32.partialorder %v866_v17, 8.507059e+37  ;;  %v869_v63 = vor.u32 1.1754944e-38, %v868_v44  ;;  %3680 = vst [vmem:[#allocation28_spill] sm:$0xff] %v2844_v26  ;;  %vm2860_vm8 = vmor %vm877_vm2, %vm878_vm4 }
 0x12a   : > { %v2833_v9 = vpop.eup %1980  ;;  %vm2839_vm6 = vcmp.eq.f32.partialorder %v881_v10, 8.507059e+37  ;;  %v883_v53 = vand.u32 2147483648, %v2633_v5  ;;  %v865_v31 = vsel %vm2821_vm3, %v2680_v13, %v861_v16  ;;  %v876_v8 = vadd.f32 %v2707_v48, %v875_v28  ;;  %v2853_v30 = vpop.f32.mrf.mxu1 }
 0x12b   : > { %v2846_v7 = vpop.eup %1982  ;;  %vm892_vm7 = vweird.f32 %v2676_v4  ;;  %3681 = vst [vmem:[#allocation29_spill] sm:$0xff] %v2853_v30  ;;  %v1312_v15 = vmul.f32 %v1280_v52, %v2738_v27  ;;  %v890_v44 = vmul.f32 %v2759_v60, %v889_v34  ;;  %vm893_vm9 = vweird.f32 %v2759_v60 }
 0x12c   : > { %v905_v13 = vmul.f32 %v2773_v23, %v904_v62  ;;  %1988 = vrcp.f32 %v2825_v24  ;;  %v918_v27 = vmul.f32 %v2827_v41, %v2757_v58  ;;  %v933_v5 = vmul.f32 %v2833_v9, %v2769_v22  ;;  %vm2893_vm12 = vmor %vm892_vm7, %vm893_vm9 }
 0x12d   : > { %1990 = vrcp.f32 %v2830_v49  ;;  %v1768_v52 = vmul.f32 -1.442695, %v2844_v26  ;;  %1392 = vmatmul.f32.gmra.mxu0 %v1311_v3  ;;  %v884_v45 = vor.u32 1.1754944e-38, %v883_v53  ;;  %vm907_vm10 = vweird.f32 %v2684_v1 }
 0x12e   : > { %v1985_v28 = vpop.eup %1984  ;;  %vm908_vm11 = vweird.f32 %v2773_v23  ;;  %v1769_v34 = vmul.f32 -1.442695, %v2853_v30  ;;  %1457 = vmatmul.f32.gmra.mxu1 %v1312_v15  ;;  %v870_v32 = vsel %vm2835_vm5, %v869_v63, %v865_v31  ;;  %v880_v55 = vsel %vm2860_vm8, %v2707_v48, %v876_v8 }
 0x12f   : > { %v1987_v62 = vpop.eup %1986  ;;  %v896_v26 = vand.u32 2147483647, %v2676_v4  ;;  %v898_v3 = vand.u32 2147483648, %v2676_v4  ;;  %v891_v53 = vadd.f32 %v2759_v60, %v890_v44  ;;  %v906_v50 = vadd.f32 %v2773_v23, %v905_v13  ;;  %vm2900_vm13 = vmor %vm907_vm10, %vm908_vm11 }
 0x130   : > { %v2868_v10 = vpop.f32.mrf.mxu2  ;;  %v911_v63 = vand.u32 2147483647, %v2684_v1  ;;  %v913_v48 = vand.u32 2147483648, %v2684_v1  ;;  %v919_v8 = vsub.f32 1.0, %v918_v27  ;;  %v934_v17 = vsub.f32 1.0, %v933_v5 }
 0x131   : > { %v2870_v16 = vpop.f32.mrf.mxu3  ;;  %v2904_v44 = vadd.f32 1.0, %v1985_v28  ;;  %1992 = vpow2.f32 %v1768_v52  ;;  %v1039_v30 = vsub.f32 1.0, %v2763_v35  ;;  %v2910_v13 = vadd.f32 1.0, %v1987_v62 }
 0x132   : > { %v2906_v4 = vpop.eup %1988  ;;  %1994 = vpow2.f32 %v1769_v34  ;;  %v1281_v1 = vmul.f32 %v870_v32, %v2559_v59  ;;  %v885_v27 = vsel %vm2839_vm6, %v884_v45, %v880_v55  ;;  %vm2917_vm14 = vcmp.eq.f32.partialorder %v896_v26, 8.507059e+37 }
 0x133   : > { %v2912_v18 = vpop.eup %1990  ;;  %v899_v52 = vor.u32 1.1754944e-38, %v898_v3  ;;  %v895_v28 = vsel %vm2893_vm12, %v2759_v60, %v891_v53  ;;  %v910_v34 = vsel %vm2900_vm13, %v2773_v23, %v906_v50  ;;  %vm2927_vm15 = vcmp.eq.f32.partialorder %v911_v63, 8.507059e+37 }
 0x134   : > { %v914_v32 = vor.u32 1.1754944e-38, %v913_v48  ;;  %v920_v40 = vmul.f32 %v2827_v41, %v919_v8  ;;  %v935_v26 = vmul.f32 %v2833_v9, %v934_v17  ;;  %v948_v60 = vmul.f32 %v2906_v4, %v2825_v24 }
 0x135   : > { %1996 = vrcp.f32 %v2904_v44  ;;  %vm922_vm0 = vweird.f32 %v2757_v58  ;;  %vm923_vm1 = vweird.f32 %v2827_v41  ;;  %v963_v23 = vmul.f32 %v2912_v18, %v2830_v49 }
 0x136   : > { %1998 = vrcp.f32 %v2910_v13  ;;  %v1282_v3 = vmul.f32 %v885_v27, %v2561_v61  ;;  %v900_v53 = vsel %vm2917_vm14, %v899_v52, %v895_v28  ;;  %vm937_vm2 = vweird.f32 %v2769_v22  ;;  %vm2958_vm4 = vmor %vm922_vm0, %vm923_vm1 }
 0x137   : > { %v1993_v45 = vpop.eup %1992  ;;  %vm938_vm3 = vweird.f32 %v2833_v9  ;;  %v915_v50 = vsel %vm2927_vm15, %v914_v32, %v910_v34  ;;  %v926_v63 = vand.u32 2147483647, %v2757_v58  ;;  %v928_v48 = vand.u32 2147483648, %v2757_v58 }
 0x138   : > { %v2931_v59 = vpop.f32.mrf.mxu2  ;;  %v1995_v15 = vpop.eup %1994  ;;  %v941_v31 = vand.u32 2147483647, %v2769_v22  ;;  %v921_v8 = vadd.f32 %v2827_v41, %v920_v40  ;;  %v936_v17 = vadd.f32 %v2833_v9, %v935_v26  ;;  %v943_v27 = vand.u32 2147483648, %v2769_v22  ;;  %vm2964_vm5 = vmor %vm937_vm2, %vm938_vm3 }
 0x139   : > { %v2933_v55 = vpop.f32.mrf.mxu3  ;;  %v949_v5 = vsub.f32 1.0, %v948_v60  ;;  %v964_v28 = vsub.f32 1.0, %v963_v23  ;;  %v2968_v34 = vadd.f32 1.0, %v1993_v45  ;;  %v1313_v62 = vmul.f32 %v1281_v1, %v2801_v21 }
 0x13a   : > { %v1314_v58 = vmul.f32 %v1282_v3, %v2803_v20  ;;  %v2975_v40 = vadd.f32 1.0, %v2784_v0  ;;  %v2978_v26 = vadd.f32 1.0, %v2813_v29  ;;  %2000 = vpow2.f32 %v1775_v54 }
 0x13b   : > { %v2972_v32 = vpop.eup %1996  ;;  %v2980_v22 = vadd.f32 1.0, %v1995_v15  ;;  %v1283_v23 = vmul.f32 %v900_v53, %v2580_v11  ;;  %v1284_v45 = vmul.f32 %v915_v50, %v2582_v12  ;;  %vm2986_vm6 = vcmp.eq.f32.partialorder %v926_v63, 8.507059e+37  ;;  %1395 = vmatmul.f32.gmra.mxu0 %v1313_v62 }
 0x13c   : > { %v2982_v60 = vpop.eup %1998  ;;  %v929_v20 = vor.u32 1.1754944e-38, %v928_v48  ;;  %1460 = vmatmul.f32.gmra.mxu1 %v1314_v58  ;;  %v925_v54 = vsel %vm2958_vm4, %v2827_v41, %v921_v8  ;;  %v940_v11 = vsel %vm2964_vm5, %v2833_v9, %v936_v17  ;;  %vm942_vm7 = vcmp.eq.f32.partialorder %v941_v31, 8.507059e+37 }
 0x13d   : > { %v944_v12 = vor.u32 1.1754944e-38, %v943_v27  ;;  %v950_v1 = vmul.f32 %v2906_v4, %v949_v5  ;;  %vm952_vm8 = vweird.f32 %v2825_v24  ;;  %v965_v3 = vmul.f32 %v2912_v18, %v964_v28 }
 0x13e   : > { %2002 = vrcp.f32 %v2968_v34  ;;  %vm953_vm9 = vweird.f32 %v2906_v4  ;;  %v978_v53 = vmul.f32 %v2972_v32, %v2904_v44  ;;  %v993_v41 = vmul.f32 %v2982_v60, %v2910_v13 }
 0x13f   : > { %2004 = vrcp.f32 %v2980_v22  ;;  %v930_v9 = vsel %vm2986_vm6, %v929_v20, %v925_v54  ;;  %v956_v15 = vand.u32 2147483647, %v2825_v24  ;;  %vm967_vm10 = vweird.f32 %v2830_v49  ;;  %vm3021_vm12 = vmor %vm952_vm8, %vm953_vm9 }
 0x140   : > { %v2990_v0 = vpop.f32.mrf.mxu2  ;;  %vm968_vm11 = vweird.f32 %v2912_v18  ;;  %v2001_v50 = vpop.eup %2000  ;;  %v945_v63 = vsel %vm942_vm7, %v944_v12, %v940_v11  ;;  %v958_v48 = vand.u32 2147483648, %v2825_v24  ;;  %v971_v31 = vand.u32 2147483647, %v2830_v49 }
 0x141   : > { %v2992_v29 = vpop.f32.mrf.mxu3  ;;  %v1315_v8 = vmul.f32 %v1283_v23, %v2868_v10  ;;  %v951_v61 = vadd.f32 %v2906_v4, %v950_v1  ;;  %v966_v27 = vadd.f32 %v2912_v18, %v965_v3  ;;  %v973_v5 = vand.u32 2147483648, %v2830_v49  ;;  %vm3030_vm13 = vmor %vm967_vm10, %vm968_vm11 }
 0x142   : > { %v1316_v52 = vmul.f32 %v1284_v45, %v2870_v16  ;;  %v1054_v28 = vsub.f32 1.0, %v2777_v14  ;;  %2006 = vrcp.f32 %v2975_v40  ;;  %v979_v62 = vsub.f32 1.0, %v978_v53 }
 0x143   : > { %v994_v24 = vsub.f32 1.0, %v993_v41  ;;  %v1040_v23 = vmul.f32 %v2665_v2, %v1039_v30  ;;  %2008 = vrcp.f32 %v2978_v26  ;;  %v1776_v49 = vmul.f32 -1.442695, %v2531_v36  ;;  %1398 = vmatmul.f32.gmra.mxu0 %v1315_v8  ;;  %v3735_v8 = vld [vmem:[#allocation29_spill] sm:$0xff] }
 0x144   : > { %v3034_v58 = vpop.eup %2002  ;;  %v1777_v14 = vmul.f32 -1.442695, %v2533_v37  ;;  %1463 = vmatmul.f32.gmra.mxu1 %v1316_v52  ;;  %v1285_v20 = vmul.f32 %v930_v9, %v2607_v46  ;;  %v1286_v35 = vmul.f32 %v945_v63, %v2612_v51  ;;  %vm3050_vm14 = vcmp.eq.f32.partialorder %v956_v15, 8.507059e+37 }
 0x145   : > { %v3046_v21 = vpop.eup %2004  ;;  %v959_v54 = vor.u32 1.1754944e-38, %v958_v48  ;;  %v955_v11 = vsel %vm3021_vm12, %v2906_v4, %v951_v61  ;;  %v970_v12 = vsel %vm3030_vm13, %v2912_v18, %v966_v27  ;;  %vm3060_vm15 = vcmp.eq.f32.partialorder %v971_v31, 8.507059e+37 }
 0x146   : > { %v974_v46 = vor.u32 1.1754944e-38, %v973_v5  ;;  %v980_v51 = vmul.f32 %v2972_v32, %v979_v62  ;;  %vm982_vm0 = vweird.f32 %v2904_v44  ;;  %vm983_vm1 = vweird.f32 %v2972_v32 }
 0x147   : > { %v995_v3 = vmul.f32 %v2982_v60, %v994_v24  ;;  %v1008_v4 = vmul.f32 %v3034_v58, %v2968_v34  ;;  %v1023_v53 = vmul.f32 %v3046_v21, %v2980_v22  ;;  %v1317_v18 = vmul.f32 %v1285_v20, %v2931_v59  ;;  %vm3093_vm4 = vmor %vm982_vm0, %vm983_vm1 }
 0x148   : > { %v3042_v16 = vpop.f32.mrf.mxu2  ;;  %v1318_v41 = vmul.f32 %v1286_v35, %v2933_v55  ;;  %v3074_v9 = vpop.eup %2006  ;;  %v3076_v15 = vadd.f32 1.0, %v2001_v50  ;;  %2010 = vpow2.f32 %v1776_v49  ;;  %vm997_vm2 = vweird.f32 %v2910_v13 }
 0x149   : > { %v3044_v45 = vpop.f32.mrf.mxu3  ;;  %vm998_vm3 = vweird.f32 %v2982_v60  ;;  %v3080_v63 = vpop.eup %2008  ;;  %v960_v48 = vsel %vm3050_vm14, %v959_v54, %v955_v11  ;;  %v975_v31 = vsel %vm3060_vm15, %v974_v46, %v970_v12  ;;  %v988_v59 = vand.u32 2147483648, %v2904_v44 }
 0x14a   : > { %v1003_v55 = vand.u32 2147483648, %v2910_v13  ;;  %v981_v50 = vadd.f32 %v2972_v32, %v980_v51  ;;  %v986_v61 = vand.u32 2147483647, %v2904_v44  ;;  %v996_v17 = vadd.f32 %v2982_v60, %v995_v3  ;;  %vm3101_vm5 = vmor %vm997_vm2, %vm998_vm3 }
 0x14b   : > { %v1001_v27 = vand.u32 2147483647, %v2910_v13  ;;  %v1055_v5 = vmul.f32 %v2694_v19, %v1054_v28  ;;  %2012 = vpow2.f32 %v1777_v14  ;;  %v1009_v10 = vsub.f32 1.0, %v1008_v4  ;;  %1401 = vmatmul.f32.gmra.mxu0 %v1317_v18 }
 0x14c   : > { %v1024_v62 = vsub.f32 1.0, %v1023_v53  ;;  %1466 = vmatmul.f32.gmra.mxu1 %v1318_v41  ;;  %v3106_v24 = vadd.f32 %v2665_v2, %v1040_v23  ;;  %vm1043_vm6 = vweird.f32 %v2665_v2  ;;  %v3111_v44 = vmul.f32 %v2846_v7, %v2780_v47 }
 0x14d   : > { %v3115_v13 = vmul.f32 %v3074_v9, %v2975_v40  ;;  %2014 = vrcp.f32 %v3076_v15  ;;  %v1287_v14 = vmul.f32 %v960_v48, %v2678_v6  ;;  %v1288_v23 = vmul.f32 %v975_v31, %v2686_v25 }
 0x14e   : > { %v989_v20 = vor.u32 1.1754944e-38, %v988_v59  ;;  %v1004_v35 = vor.u32 1.1754944e-38, %v1003_v55  ;;  %v2011_v30 = vpop.eup %2010  ;;  %vm1042_vm7 = vweird.f32 %v2605_v39  ;;  %v985_v54 = vsel %vm3093_vm4, %v2972_v32, %v981_v50 }
 0x14f   : > { %vm987_vm8 = vcmp.eq.f32.partialorder %v986_v61, 8.507059e+37  ;;  %v1000_v11 = vsel %vm3101_vm5, %v2982_v60, %v996_v17  ;;  %vm1002_vm9 = vcmp.eq.f32.partialorder %v1001_v27, 8.507059e+37  ;;  %vm1057_vm10 = vweird.f32 %v2620_v57 }
 0x150   : > { %v3118_v28 = vpop.f32.mrf.mxu2  ;;  %v1010_v6 = vmul.f32 %v3034_v58, %v1009_v10  ;;  %v1025_v25 = vmul.f32 %v3046_v21, %v1024_v62  ;;  %v1319_v12 = vmul.f32 %v1287_v14, %v2990_v0  ;;  %v1320_v1 = vmul.f32 %v1288_v23, %v2992_v29 }
 0x151   : > { %v3120_v49 = vpop.f32.mrf.mxu3  ;;  %v1778_v46 = vmul.f32 -1.442695, %v2541_v42  ;;  %v1779_v32 = vmul.f32 -1.442695, %v2543_v43  ;;  %vm1012_vm11 = vweird.f32 %v2968_v34  ;;  %vm1013_vm12 = vweird.f32 %v3034_v58  ;;  %v2013_v60 = vpop.eup %2012 }
 0x152   : > { %v990_v51 = vsel %vm987_vm8, %v989_v20, %v985_v54  ;;  %v1005_v3 = vsel %vm1002_vm9, %v1004_v35, %v1000_v11  ;;  %vm1027_vm13 = vweird.f32 %v2980_v22  ;;  %vm1028_vm14 = vweird.f32 %v3046_v21  ;;  %vm3167_vm2 = vmor %vm1012_vm11, %vm1013_vm12 }
 0x153   : > { %v3142_v4 = vpop.eup %2014  ;;  %v3710_v0 = vand.u32 2147483647, %v2605_v39  ;;  %v1016_v53 = vand.u32 2147483647, %v2968_v34  ;;  %v1018_v18 = vand.u32 2147483648, %v2968_v34  ;;  %v1033_v48 = vand.u32 2147483648, %v2980_v22  ;;  %1404 = vmatmul.f32.gmra.mxu0 %v1319_v12  ;;  %vm3180_vm3 = vmor %vm1027_vm13, %vm1028_vm14 }
 0x154   : > { %v1031_v41 = vand.u32 2147483647, %v2980_v22  ;;  %v1056_v31 = vadd.f32 %v2694_v19, %v1055_v5  ;;  %vm1058_vm0 = vweird.f32 %v2694_v19  ;;  %v3713_v59 = vand.u32 2147483647, %v2620_v57  ;;  %1469 = vmatmul.f32.gmra.mxu1 %v1320_v1  ;;  %vm3204_vm8 = vmor %vm1042_vm7, %vm1043_vm6 }
 0x155   : > { %vm3146_vm15 = vcmp.eq.f32.partialorder %v3710_v0, 8.507059e+37  ;;  %v1011_v50 = vadd.f32 %v3034_v58, %v1010_v6  ;;  %v1026_v61 = vadd.f32 %v3046_v21, %v1025_v25  ;;  %v1069_v17 = vsub.f32 1.0, %v3111_v44  ;;  %vm3224_vm6 = vmor %vm1057_vm10, %vm1058_vm0 }
 0x156   : > { %vm3158_vm1 = vcmp.eq.f32.partialorder %v3713_v59, 8.507059e+37  ;;  %v1084_v27 = vsub.f32 1.0, %v3115_v13  ;;  %v3174_v5 = vadd.f32 1.0, %v2011_v30  ;;  %2016 = vpow2.f32 %v1778_v46  ;;  %v3729_v46 = vld [vmem:[#allocation27_spill] sm:$0xff]  ;;  %v3734_v59 = vld [vmem:[#allocation28_spill] sm:$0xff] }
 0x157   : > { %v3184_v52 = vadd.f32 1.0, %v2013_v60  ;;  %2018 = vpow2.f32 %v1779_v32  ;;  %v1289_v10 = vmul.f32 %v990_v51, %v2771_v38  ;;  %v1290_v62 = vmul.f32 %v1005_v3, %v2782_v56  ;;  %v3730_v51 = vld [vmem:[#allocation21_spill] sm:$0xff] }
 0x158   : > { %vm3188_vm4 = vcmp.eq.f32.partialorder %v1016_v53, 8.507059e+37  ;;  %v1019_v13 = vor.u32 1.1754944e-38, %v1018_v18  ;;  %vm3192_vm5 = vcmp.eq.f32.partialorder %v1031_v41, 8.507059e+37  ;;  %v1034_v22 = vor.u32 1.1754944e-38, %v1033_v48  ;;  %v3196_v23 = vpop.f32.mrf.mxu2  ;;  %v3733_v41 = vld [vmem:[#allocation22_spill] sm:$0xff] }
 0x159   : > { %v3198_v20 = vpop.f32.mrf.mxu3  ;;  %v1015_v56 = vsel %vm3167_vm2, %v3034_v58, %v1011_v50  ;;  %v1030_v35 = vsel %vm3180_vm3, %v3046_v21, %v1026_v61  ;;  %v1321_v30 = vmul.f32 %v1289_v10, %v3042_v16  ;;  %v1322_v54 = vmul.f32 %v1290_v62, %v3044_v45 }
 0x15a   : > { %v1045_v39 = vsel %vm3204_vm8, %v2665_v2, %v3106_v24  ;;  %v3728_v58 = vand.u32 2147483648, %v2620_v57  ;;  %vm1072_vm7 = vweird.f32 %v2780_v47  ;;  %v1076_v16 = vand.u32 2147483647, %v2780_v47 }
 0x15b   : > { %v1060_v45 = vsel %vm3224_vm6, %v2694_v19, %v1056_v31  ;;  %v1070_v2 = vmul.f32 %v2846_v7, %v1069_v17  ;;  %v1085_v24 = vmul.f32 %v3074_v9, %v1084_v27  ;;  %v1098_v6 = vmul.f32 %v3080_v63, %v2978_v26  ;;  %1407 = vmatmul.f32.gmra.mxu0 %v1321_v30 }
 0x15c   : > { %v1064_v21 = vor.u32 1.1754944e-38, %v3728_v58  ;;  %v2017_v25 = vpop.eup %2016  ;;  %v1113_v57 = vmul.f32 %v3142_v4, %v3076_v15  ;;  %2020 = vrcp.f32 %v3174_v5  ;;  %v1020_v12 = vsel %vm3188_vm4, %v1019_v13, %v1015_v56  ;;  %1472 = vmatmul.f32.gmra.mxu1 %v1322_v54  ;;  %v3736_v13 = vld [vmem:[#allocation16_spill] sm:$0xff]  ;;  %v3737_v54 = vld [vmem:[#allocation17_spill] sm:$0xff] }
 0x15d   : > { %v1035_v1 = vsel %vm3192_vm5, %v1034_v22, %v1030_v35  ;;  %v2019_v19 = vpop.eup %2018  ;;  %v1050_v32 = vsel %vm3146_vm15, %v3729_v46, %v1045_v39  ;;  %v1078_v60 = vand.u32 2147483648, %v2780_v47  ;;  %2022 = vrcp.f32 %v3184_v52 }
 0x15e   : > { %v1780_v3 = vmul.f32 -1.442695, %v3730_v51  ;;  %v1065_v0 = vsel %vm3158_vm1, %v1064_v21, %v1060_v45  ;;  %vm3254_vm9 = vcmp.eq.f32.partialorder %v1076_v16, 8.507059e+37  ;;  %v1091_v18 = vand.u32 2147483647, %v2975_v40 }
 0x15f   : > { %v1093_v29 = vand.u32 2147483648, %v2975_v40  ;;  %v1781_v48 = vmul.f32 -1.442695, %v3733_v41  ;;  %v1071_v31 = vadd.f32 %v2846_v7, %v1070_v2  ;;  %vm1073_vm10 = vweird.f32 %v2846_v7 }
 0x160   : > { %v1291_v50 = vmul.f32 %v1020_v12, %v3734_v59  ;;  %v1292_v61 = vmul.f32 %v1035_v1, %v3735_v8  ;;  %v1086_v55 = vadd.f32 %v3074_v9, %v1085_v24  ;;  %vm1088_vm11 = vweird.f32 %v3074_v9  ;;  %v3276_v56 = vpop.f32.mrf.mxu2  ;;  %vm3287_vm12 = vmor %vm1072_vm7, %vm1073_vm10  ;;  %v3748_v8 = vld [vmem:[#allocation18_spill] sm:$0xff] }
 0x161   : > { %v1099_v17 = vsub.f32 1.0, %v1098_v6  ;;  %v1114_v27 = vsub.f32 1.0, %v1113_v57  ;;  %v3267_v34 = vadd.f32 1.0, %v2017_v25  ;;  %2024 = vpow2.f32 %v1780_v3  ;;  %v3278_v35 = vpop.f32.mrf.mxu3  ;;  %v3745_v25 = vld [vmem:[#allocation24_spill] sm:$0xff] }
 0x162   : > { %v1323_v10 = vmul.f32 %v1291_v50, %v3118_v28  ;;  %v1324_v62 = vmul.f32 %v1292_v61, %v3120_v49  ;;  %v3271_v44 = vpop.eup %2020  ;;  %v1293_v14 = vmul.f32 %v1050_v32, %v3736_v13  ;;  %v1079_v22 = vor.u32 1.1754944e-38, %v1078_v60  ;;  %v3756_v49 = vld [vmem:[#allocation25_spill] sm:$0xff] }
 0x163   : > { %v3274_v38 = vadd.f32 1.0, %v2019_v19  ;;  %2026 = vpow2.f32 %v1781_v48  ;;  %v3280_v30 = vpop.eup %2022  ;;  %v1294_v39 = vmul.f32 %v1065_v0, %v3737_v54  ;;  %vm1087_vm13 = vweird.f32 %v2975_v40 }
 0x164   : > { %vm3292_vm14 = vcmp.eq.f32.partialorder %v1091_v18, 8.507059e+37  ;;  %v1094_v11 = vor.u32 1.1754944e-38, %v1093_v29  ;;  %v1075_v58 = vsel %vm3287_vm12, %v2846_v7, %v1071_v31  ;;  %vm3301_vm15 = vmor %vm1087_vm13, %vm1088_vm11  ;;  %v1100_v47 = vmul.f32 %v3080_v63, %v1099_v17  ;;  %v3744_v7 = vld [vmem:[#allocation23_spill] sm:$0xff]  ;;  %1410 = vmatmul.f32.gmra.mxu0 %v1323_v10  ;;  %1475 = vmatmul.f32.gmra.mxu1 %v1324_v62 }
 0x165   : > { %vm1102_vm0 = vweird.f32 %v2978_v26  ;;  %v1106_v40 = vand.u32 2147483647, %v2978_v26  ;;  %v1090_v16 = vsel %vm3301_vm15, %v3074_v9, %v1086_v55  ;;  %v1115_v45 = vmul.f32 %v3142_v4, %v1114_v27  ;;  %v3755_v62 = vld [vmem:[#allocation19_spill] sm:$0xff] }
 0x166   : > { %2028 = vrcp.f32 %v3267_v34  ;;  %v1782_v2 = vmul.f32 -1.442695, %v3744_v7  ;;  %v1128_v24 = vmul.f32 %v3271_v44, %v3174_v5  ;;  %v1143_v6 = vmul.f32 %v3280_v30, %v3184_v52 }
 0x167   : > { %2030 = vrcp.f32 %v3274_v38  ;;  %v1783_v57 = vmul.f32 -1.442695, %v3745_v25  ;;  %v2025_v12 = vpop.eup %2024  ;;  %v1080_v9 = vsel %vm3254_vm9, %v1079_v22, %v1075_v58  ;;  %vm1103_vm1 = vweird.f32 %v3080_v63 }
 0x168   : > { %v1108_v1 = vand.u32 2147483648, %v2978_v26  ;;  %v1121_v19 = vand.u32 2147483647, %v3076_v15  ;;  %v1095_v32 = vsel %vm3292_vm14, %v1094_v11, %v1090_v16  ;;  %v1101_v60 = vadd.f32 %v3080_v63, %v1100_v47  ;;  %vm3341_vm3 = vmor %vm1102_vm0, %vm1103_vm1 }
 0x169   : > { %v2027_v46 = vpop.eup %2026  ;;  %vm1118_vm2 = vweird.f32 %v3142_v4  ;;  %v1123_v3 = vand.u32 2147483648, %v3076_v15  ;;  %v1116_v0 = vadd.f32 %v3142_v4, %v1115_v45  ;;  %2032 = vpow2.f32 %v1782_v2  ;;  %v651_v10 = vpop.f32.mrf.mxu3 }
 0x16a   : > { %v1325_v53 = vmul.f32 %v1293_v14, %v3196_v23  ;;  %v1326_v18 = vmul.f32 %v1294_v39, %v3198_v20  ;;  %v1129_v29 = vsub.f32 1.0, %v1128_v24  ;;  %v1144_v48 = vsub.f32 1.0, %v1143_v6 }
 0x16b   : > { %v3333_v31 = vadd.f32 1.0, %v2025_v12  ;;  %2034 = vpow2.f32 %v1783_v57  ;;  %vm1117_vm4 = vweird.f32 %v3076_v15  ;;  %v3346_v23 = vadd.f32 1.0, %v2027_v46  ;;  %v586_v15 = vpop.f32.mrf.mxu2 }
 0x16c   : > { %v3335_v59 = vpop.eup %2028  ;;  %v1295_v61 = vmul.f32 %v1080_v9, %v3748_v8  ;;  %vm3351_vm5 = vcmp.eq.f32.partialorder %v1106_v40, 8.507059e+37  ;;  %v1109_v17 = vor.u32 1.1754944e-38, %v1108_v1  ;;  %vm3357_vm8 = vmor %vm1117_vm4, %vm1118_vm2  ;;  %vm3361_vm6 = vcmp.eq.f32.partialorder %v1121_v19, 8.507059e+37  ;;  %1413 = vmatmul.f32.gmra.mxu0 %v1325_v53  ;;  %1478 = vmatmul.f32.gmra.mxu1 %v1326_v18 }
 0x16d   : > { %v3348_v20 = vpop.eup %2030  ;;  %v1296_v13 = vmul.f32 %v1095_v32, %v3755_v62  ;;  %v1105_v14 = vsel %vm3341_vm3, %v3080_v63, %v1101_v60  ;;  %v1120_v22 = vsel %vm3357_vm8, %v3142_v4, %v1116_v0  ;;  %v1124_v54 = vor.u32 1.1754944e-38, %v1123_v3  ;;  %v3757_v4 = vld [vmem:[#allocation26_spill] sm:$0xff]  ;;  %v3760_v3 = vld [vmem:[#allocation20_spill] sm:$0xff] }
 0x16e   : > { %v1130_v39 = vmul.f32 %v3271_v44, %v1129_v29  ;;  %v1145_v28 = vmul.f32 %v3280_v30, %v1144_v48  ;;  %2036 = vrcp.f32 %v3333_v31  ;;  %v1784_v11 = vmul.f32 -1.442695, %v3756_v49 }
 0x16f   : > { %v2033_v58 = vpop.eup %2032  ;;  %v1158_v21 = vmul.f32 %v3335_v59, %v3267_v34  ;;  %v1173_v63 = vmul.f32 %v3348_v20, %v3274_v38  ;;  %2038 = vrcp.f32 %v3346_v23  ;;  %v1785_v47 = vmul.f32 -1.442695, %v3757_v4 }
 0x170   : > { %v1110_v16 = vsel %vm3351_vm5, %v1109_v17, %v1105_v14  ;;  %v1125_v45 = vsel %vm3361_vm6, %v1124_v54, %v1120_v22  ;;  %vm1132_vm7 = vweird.f32 %v3174_v5  ;;  %vm1133_vm9 = vweird.f32 %v3271_v44 }
 0x171   : > { %v2035_v40 = vpop.eup %2034  ;;  %vm1148_vm10 = vweird.f32 %v3280_v30  ;;  %v1327_v2 = vmul.f32 %v1295_v61, %v3276_v56  ;;  %v1328_v24 = vmul.f32 %v1296_v13, %v3278_v35  ;;  %v1131_v6 = vadd.f32 %v3271_v44, %v1130_v39  ;;  %vm3399_vm11 = vmor %vm1132_vm7, %vm1133_vm9  ;;  %v654_v61 = vpop.f32.mrf.mxu3 }
 0x172   : > { %v1146_v57 = vadd.f32 %v3280_v30, %v1145_v28  ;;  %v3393_v12 = vadd.f32 1.0, %v2033_v58  ;;  %2040 = vpow2.f32 %v1784_v11  ;;  %v1159_v9 = vsub.f32 1.0, %v1158_v21 }
 0x173   : > { %v1174_v1 = vsub.f32 1.0, %v1173_v63  ;;  %v3395_v19 = vadd.f32 1.0, %v2035_v40  ;;  %2042 = vpow2.f32 %v1785_v47  ;;  %v1138_v56 = vand.u32 2147483648, %v3174_v5  ;;  %v589_v8 = vpop.f32.mrf.mxu2 }
 0x174   : > { %v3397_v46 = vpop.eup %2036  ;;  %vm1147_vm12 = vweird.f32 %v3184_v52  ;;  %v1153_v35 = vand.u32 2147483648, %v3184_v52  ;;  %v1297_v0 = vmul.f32 %v1110_v16, %v3760_v3  ;;  %v1136_v53 = vand.u32 2147483647, %v3174_v5  ;;  %1416 = vmatmul.f32.gmra.mxu0 %v1327_v2  ;;  %1481 = vmatmul.f32.gmra.mxu1 %v1328_v24 }
 0x175   : > { %v3406_v60 = vpop.eup %2038  ;;  %vm3412_vm13 = vmor %vm1147_vm12, %vm1148_vm10  ;;  %v1151_v29 = vand.u32 2147483647, %v3184_v52  ;;  %v1298_v48 = vmul.f32 %v1125_v45, %v2527_v33  ;;  %v1135_v50 = vsel %vm3399_vm11, %v3271_v44, %v1131_v6  ;;  %2044 = vrcp.f32 %v3393_v12 }
 0x176   : > { %v1150_v5 = vsel %vm3412_vm13, %v3280_v30, %v1146_v57  ;;  %v1160_v55 = vmul.f32 %v3335_v59, %v1159_v9  ;;  %v1175_v52 = vmul.f32 %v3348_v20, %v1174_v1  ;;  %v1188_v17 = vmul.f32 %v3397_v46, %v3333_v31 }
 0x177   : > { %2046 = vrcp.f32 %v3395_v19  ;;  %v1139_v26 = vor.u32 1.1754944e-38, %v1138_v56  ;;  %v1154_v44 = vor.u32 1.1754944e-38, %v1153_v35  ;;  %v1203_v27 = vmul.f32 %v3406_v60, %v3346_v23 }
 0x178   : > { %v2041_v33 = vpop.eup %2040  ;;  %vm1137_vm14 = vcmp.eq.f32.partialorder %v1136_v53, 8.507059e+37  ;;  %vm1152_vm15 = vcmp.eq.f32.partialorder %v1151_v29, 8.507059e+37  ;;  %v1329_v62 = vmul.f32 %v1297_v0, %v586_v15  ;;  %v1330_v13 = vmul.f32 %v1298_v48, %v651_v10 }
 0x179   : > { %v2043_v30 = vpop.eup %2042  ;;  %v1140_v14 = vsel %vm1137_vm14, %v1139_v26, %v1135_v50  ;;  %v1155_v22 = vsel %vm1152_vm15, %v1154_v44, %v1150_v5  ;;  %vm1163_vm0 = vweird.f32 %v3335_v59  ;;  %vm1178_vm1 = vweird.f32 %v3348_v20 }
 0x17a   : > { %v1161_v54 = vadd.f32 %v3335_v59, %v1160_v55  ;;  %v1176_v39 = vadd.f32 %v3348_v20, %v1175_v52  ;;  %v1189_v28 = vsub.f32 1.0, %v1188_v17  ;;  %v3436_v11 = vadd.f32 1.0, %v2041_v33 }
 0x17b   : > { %v3438_v58 = vpop.eup %2044  ;;  %vm1162_vm2 = vweird.f32 %v3267_v34  ;;  %v1204_v21 = vsub.f32 1.0, %v1203_v27  ;;  %v3441_v15 = vadd.f32 1.0, %v2043_v30  ;;  %v1168_v47 = vand.u32 2147483648, %v3267_v34  ;;  %v592_v1 = vpop.f32.mrf.mxu2 }
 0x17c   : > { %vm3445_vm3 = vmor %vm1162_vm2, %vm1163_vm0  ;;  %vm1177_vm4 = vweird.f32 %v3274_v38  ;;  %v1183_v40 = vand.u32 2147483648, %v3274_v38  ;;  %1419 = vmatmul.f32.gmra.mxu0 %v1329_v62  ;;  %1484 = vmatmul.f32.gmra.mxu1 %v1330_v13  ;;  %v1299_v16 = vmul.f32 %v1140_v14, %v2531_v36  ;;  %v1300_v45 = vmul.f32 %v1155_v22, %v2533_v37 }
 0x17d   : > { %v3443_v10 = vpop.eup %2046  ;;  %v1166_v2 = vand.u32 2147483647, %v3267_v34  ;;  %vm3457_vm5 = vmor %vm1177_vm4, %vm1178_vm1  ;;  %v1181_v6 = vand.u32 2147483647, %v3274_v38  ;;  %v1165_v57 = vsel %vm3445_vm3, %v3335_v59, %v1161_v54  ;;  %v1190_v37 = vmul.f32 %v3397_v46, %v1189_v28  ;;  %v657_v59 = vpop.f32.mrf.mxu3 }
 0x17e   : > { %v1180_v36 = vsel %vm3457_vm5, %v3348_v20, %v1176_v39  ;;  %2048 = vrcp.f32 %v3436_v11  ;;  %v1205_v34 = vmul.f32 %v3406_v60, %v1204_v21  ;;  %v1218_v9 = vmul.f32 %v3438_v58, %v3393_v12 }
 0x17f   : > { %v1233_v38 = vmul.f32 %v3443_v10, %v3395_v19  ;;  %2050 = vrcp.f32 %v3441_v15  ;;  %v1169_v32 = vor.u32 1.1754944e-38, %v1168_v47  ;;  %v1184_v56 = vor.u32 1.1754944e-38, %v1183_v40 }
 0x180   : > { %v1331_v35 = vmul.f32 %v1299_v16, %v589_v8  ;;  %v1332_v20 = vmul.f32 %v1300_v45, %v654_v61  ;;  %vm1167_vm8 = vcmp.eq.f32.partialorder %v1166_v2, 8.507059e+37  ;;  %vm1182_vm6 = vcmp.eq.f32.partialorder %v1181_v6, 8.507059e+37 }
 0x181   : > { %v1198_v3 = vand.u32 2147483648, %v3333_v31  ;;  %v1170_v0 = vsel %vm1167_vm8, %v1169_v32, %v1165_v57  ;;  %v1185_v53 = vsel %vm1182_vm6, %v1184_v56, %v1180_v36  ;;  %vm1193_vm7 = vweird.f32 %v3397_v46 }
 0x182   : > { %vm1208_vm9 = vweird.f32 %v3406_v60  ;;  %v1191_v18 = vadd.f32 %v3397_v46, %v1190_v37  ;;  %v1206_v29 = vadd.f32 %v3406_v60, %v1205_v34  ;;  %v1219_v48 = vsub.f32 1.0, %v1218_v9 }
 0x183   : > { %v1234_v50 = vsub.f32 1.0, %v1233_v38  ;;  %vm1192_vm10 = vweird.f32 %v3333_v31  ;;  %v1196_v55 = vand.u32 2147483647, %v3333_v31  ;;  %vm1207_vm12 = vweird.f32 %v3346_v23  ;;  %v595_v54 = vpop.f32.mrf.mxu2 }
 0x184   : > { %v3481_v5 = vpop.eup %2048  ;;  %1422 = vmatmul.f32.gmra.mxu0 %v1331_v35  ;;  %1487 = vmatmul.f32.gmra.mxu1 %v1332_v20  ;;  %vm3486_vm11 = vmor %vm1192_vm10, %vm1193_vm7  ;;  %v1213_v52 = vand.u32 2147483648, %v3346_v23  ;;  %v1301_v17 = vmul.f32 %v1170_v0, %v2541_v42  ;;  %v1302_v33 = vmul.f32 %v1185_v53, %v2543_v43  ;;  %v1199_v26 = vor.u32 1.1754944e-38, %v1198_v3 }
 0x185   : > { %v3484_v8 = vpop.eup %2050  ;;  %vm3497_vm13 = vmor %vm1207_vm12, %vm1208_vm9  ;;  %v1211_v27 = vand.u32 2147483647, %v3346_v23  ;;  %v1195_v31 = vsel %vm3486_vm11, %v3397_v46, %v1191_v18  ;;  %v1220_v42 = vmul.f32 %v3438_v58, %v1219_v48  ;;  %v1235_v43 = vmul.f32 %v3443_v10, %v1234_v50  ;;  %v660_v46 = vpop.f32.mrf.mxu3 }
 0x186   : > { %v1210_v30 = vsel %vm3497_vm13, %v3406_v60, %v1206_v29  ;;  %v1248_v62 = vmul.f32 %v3481_v5, %v3436_v11  ;;  %v1263_v13 = vmul.f32 %v3484_v8, %v3441_v15  ;;  %v1333_v14 = vmul.f32 %v1301_v17, %v592_v1 }
 0x187   : > { %v1334_v23 = vmul.f32 %v1302_v33, %v657_v59  ;;  %vm1197_vm14 = vcmp.eq.f32.partialorder %v1196_v55, 8.507059e+37  ;;  %v1214_v22 = vor.u32 1.1754944e-38, %v1213_v52  ;;  %vm1212_vm15 = vcmp.eq.f32.partialorder %v1211_v27, 8.507059e+37 }
 0x188   : > { %v1200_v39 = vsel %vm1197_vm14, %v1199_v26, %v1195_v31  ;;  %vm1223_vm0 = vweird.f32 %v3438_v58  ;;  %v1221_v28 = vadd.f32 %v3438_v58, %v1220_v42  ;;  %v1236_v21 = vadd.f32 %v3443_v10, %v1235_v43 }
 0x189   : > { %v1215_v60 = vsel %vm1212_vm15, %v1214_v22, %v1210_v30  ;;  %vm1238_vm1 = vweird.f32 %v3443_v10  ;;  %vm1222_vm2 = vweird.f32 %v3393_v12  ;;  %v1249_v63 = vsub.f32 1.0, %v1248_v62 }
 0x18a   : > { %v1264_v47 = vsub.f32 1.0, %v1263_v13  ;;  %vm3519_vm3 = vmor %vm1222_vm2, %vm1223_vm0  ;;  %v1228_v16 = vand.u32 2147483648, %v3393_v12  ;;  %vm1237_vm4 = vweird.f32 %v3395_v19  ;;  %v1243_v45 = vand.u32 2147483648, %v3395_v19 }
 0x18b   : > { %v1303_v2 = vmul.f32 %v1200_v39, %v3730_v51  ;;  %v1304_v24 = vmul.f32 %v1215_v60, %v3733_v41  ;;  %v1226_v6 = vand.u32 2147483647, %v3393_v12  ;;  %vm1239_vm5 = vmor %vm1237_vm4, %vm1238_vm1  ;;  %v1241_v57 = vand.u32 2147483647, %v3395_v19  ;;  %v598_v19 = vpop.f32.mrf.mxu2 }
 0x18c   : > { %1425 = vmatmul.f32.gmra.mxu0 %v1333_v14  ;;  %1490 = vmatmul.f32.gmra.mxu1 %v1334_v23  ;;  %v1225_v36 = vsel %vm3519_vm3, %v3438_v58, %v1221_v28  ;;  %v1240_v37 = vsel %vm1239_vm5, %v3443_v10, %v1236_v21  ;;  %v1250_v34 = vmul.f32 %v3481_v5, %v1249_v63  ;;  %v1229_v51 = vor.u32 1.1754944e-38, %v1228_v16 }
 0x18d   : > { %v1265_v9 = vmul.f32 %v3484_v8, %v1264_v47  ;;  %v1335_v38 = vmul.f32 %v1303_v2, %v595_v54  ;;  %v1336_v1 = vmul.f32 %v1304_v24, %v660_v46  ;;  %v1244_v59 = vor.u32 1.1754944e-38, %v1243_v45  ;;  %v663_v32 = vpop.f32.mrf.mxu3 }
 0x18e   : > { %vm1227_vm8 = vcmp.eq.f32.partialorder %v1226_v6, 8.507059e+37  ;;  %vm1242_vm6 = vcmp.eq.f32.partialorder %v1241_v57, 8.507059e+37  ;;  %vm1253_vm7 = vweird.f32 %v3481_v5  ;;  %v1251_v58 = vadd.f32 %v3481_v5, %v1250_v34 }
 0x18f   : > { %v1230_v41 = vsel %vm1227_vm8, %v1229_v51, %v1225_v36  ;;  %v1245_v12 = vsel %vm1242_vm6, %v1244_v59, %v1240_v37  ;;  %v1266_v10 = vadd.f32 %v3484_v8, %v1265_v9  ;;  %vm1268_vm9 = vweird.f32 %v3484_v8 }
 0x190   : > { %vm1252_vm10 = vweird.f32 %v3436_v11  ;;  %v1256_v56 = vand.u32 2147483647, %v3436_v11  ;;  %v1258_v35 = vand.u32 2147483648, %v3436_v11  ;;  %v1273_v20 = vand.u32 2147483648, %v3441_v15 }
 0x191   : > { %v1305_v3 = vmul.f32 %v1230_v41, %v3744_v7  ;;  %v1306_v0 = vmul.f32 %v1245_v12, %v3745_v25  ;;  %vm1254_vm11 = vmor %vm1252_vm10, %vm1253_vm7  ;;  %vm1267_vm12 = vweird.f32 %v3441_v15  ;;  %v1271_v53 = vand.u32 2147483647, %v3441_v15 }
 0x192   : > { %vm1269_vm13 = vmor %vm1267_vm12, %vm1268_vm9  ;;  %v1255_v18 = vsel %vm1254_vm11, %v3481_v5, %v1251_v58  ;;  %v1259_v61 = vor.u32 1.1754944e-38, %v1258_v35  ;;  %v1274_v11 = vor.u32 1.1754944e-38, %v1273_v20  ;;  %vm1257_vm14 = vcmp.eq.f32.partialorder %v1256_v56, 8.507059e+37 }
 0x193   : > { %v1270_v29 = vsel %vm1269_vm13, %v3484_v8, %v1266_v10  ;;  %v1337_v48 = vmul.f32 %v1305_v3, %v598_v19  ;;  %v1338_v50 = vmul.f32 %v1306_v0, %v663_v32  ;;  %vm1272_vm15 = vcmp.eq.f32.partialorder %v1271_v53, 8.507059e+37  ;;  %v601_v25 = vpop.f32.mrf.mxu2 }
 0x194   : > { %1428 = vmatmul.f32.gmra.mxu0 %v1335_v38  ;;  %1493 = vmatmul.f32.gmra.mxu1 %v1336_v1  ;;  %v1260_v7 = vsel %vm1257_vm14, %v1259_v61, %v1255_v18  ;;  %v1275_v55 = vsel %vm1272_vm15, %v1274_v11, %v1270_v29 }
 0x195   : > { %v666_v52 = vpop.f32.mrf.mxu3  ;;  %v1307_v15 = vmul.f32 %v1260_v7, %v3756_v49  ;;  %v1308_v17 = vmul.f32 %v1275_v55, %v3757_v4 }
 0x197   : > { %v1339_v5 = vmul.f32 %v1307_v15, %v601_v25  ;;  %v1340_v33 = vmul.f32 %v1308_v17, %v666_v52 }
 0x19c   : > { %1431 = vmatmul.f32.gmra.mxu0 %v1337_v48  ;;  %1496 = vmatmul.f32.gmra.mxu1 %v1338_v50 }
 0x1a2   : > { %v1390_v8 = vpop.f32.mrf.mxu0 }
 0x1a3   : > { %v1455_v26 = vpop.f32.mrf.mxu1 }
 0x1a4   : > { %1434 = vmatmul.f32.gmra.mxu0 %v1339_v5  ;;  %1499 = vmatmul.f32.gmra.mxu1 %v1340_v33  ;;  %v1456_v44 = vadd.f32 %v1455_v26, %v1390_v8 }
 0x1a6   : > { %1590 = vst [vmem:[%s3554_s1] sm:$0xff] %v1456_v44 }
 0x1aa   : > { %v1393_v27 = vpop.f32.mrf.mxu0 }
 0x1ab   : > { %v1458_v49 = vpop.f32.mrf.mxu1 }
 0x1ac   : > { %v1459_v31 = vadd.f32 %v1458_v49, %v1393_v27 }
 0x1ae   : > { %1591 = vst [vmem:[%s3554_s1 + $0x8] sm:$0xff] %v1459_v31 }
 0x1b8   : > { %v1396_v4 = vpop.f32.mrf.mxu0 }
 0x1b9   : > { %v1461_v30 = vpop.f32.mrf.mxu1 }
 0x1ba   : > { %v1462_v42 = vadd.f32 %v1461_v30, %v1396_v4 }
 0x1bc   : > { %1592 = vst [vmem:[%s3554_s1 + $0x10] sm:$0xff] %v1462_v42 }
 0x1c0   : > { %v1399_v43 = vpop.f32.mrf.mxu0 }
 0x1c1   : > { %v1464_v62 = vpop.f32.mrf.mxu1 }
 0x1c2   : > { %v1465_v13 = vadd.f32 %v1464_v62, %v1399_v43 }
 0x1c4   : > { %1593 = vst [vmem:[%s3554_s1 + $0x18] sm:$0xff] %v1465_v13 }
 0x1c8   : > { %v1402_v14 = vpop.f32.mrf.mxu0 }
 0x1c9   : > { %v1467_v23 = vpop.f32.mrf.mxu1 }
 0x1ca   : > { %v1468_v22 = vadd.f32 %v1467_v23, %v1402_v14 }
 0x1cc   : > { %1594 = vst [vmem:[%s3554_s1 + $0x20] sm:$0xff] %v1468_v22 }
 0x1d0   : > { %v1405_v54 = vpop.f32.mrf.mxu0 }
 0x1d1   : > { %v1470_v46 = vpop.f32.mrf.mxu1 }
 0x1d2   : > { %v1471_v39 = vadd.f32 %v1470_v46, %v1405_v54 }
 0x1d4   : > { %1595 = vst [vmem:[%s3554_s1 + $0x28] sm:$0xff] %v1471_v39 }
 0x1d8   : > { %v1408_v60 = vpop.f32.mrf.mxu0 }
 0x1d9   : > { %v1473_v28 = vpop.f32.mrf.mxu1 }
 0x1da   : > { %v1474_v21 = vadd.f32 %v1473_v28, %v1408_v60 }
 0x1dc   : > { %1596 = vst [vmem:[%s3554_s1 + $0x30] sm:$0xff] %v1474_v21 }
 0x1e1   : > { %v1411_v63 = vpop.f32.mrf.mxu0  ;;  %v1476_v47 = vpop.f32.mrf.mxu1 }
 0x1e2   : > { %v1477_v40 = vadd.f32 %v1476_v47, %v1411_v63 }
 0x1e4   : > { %1597 = vst [vmem:[%s3554_s1 + $0x38] sm:$0xff] %v1477_v40 }
 0x1e9   : > { %v1414_v16 = vpop.f32.mrf.mxu0  ;;  %v1479_v45 = vpop.f32.mrf.mxu1 }
 0x1ea   : > { %v1480_v2 = vadd.f32 %v1479_v45, %v1414_v16 }
 0x1ec   : > { %1598 = vst [vmem:[%s3554_s1 + $0x40] sm:$0xff] %v1480_v2 }
 0x1f1   : > { %v1417_v24 = vpop.f32.mrf.mxu0  ;;  %v1482_v6 = vpop.f32.mrf.mxu1 }
 0x1f2   : > { %v1483_v57 = vadd.f32 %v1482_v6, %v1417_v24 }
 0x1f4   : > { %1599 = vst [vmem:[%s3554_s1 + $0x48] sm:$0xff] %v1483_v57 }
 0x1f9   : > { %v1420_v36 = vpop.f32.mrf.mxu0  ;;  %v1485_v37 = vpop.f32.mrf.mxu1 }
 0x1fa   : > { %v1486_v34 = vadd.f32 %v1485_v37, %v1420_v36 }
 0x1fc   : > { %1600 = vst [vmem:[%s3554_s1 + $0x50] sm:$0xff] %v1486_v34 }
 0x201   : > { %v1423_v9 = vpop.f32.mrf.mxu0  ;;  %v1488_v38 = vpop.f32.mrf.mxu1 }
 0x202   : > { %v1489_v1 = vadd.f32 %v1488_v38, %v1423_v9 }
 0x204   : > { %1601 = vst [vmem:[%s3554_s1 + $0x58] sm:$0xff] %v1489_v1 }
 0x209   : > { %v1426_v51 = vpop.f32.mrf.mxu0  ;;  %v1491_v59 = vpop.f32.mrf.mxu1 }
 0x20a   : > { %v1492_v41 = vadd.f32 %v1491_v59, %v1426_v51 }
 0x20c   : > { %1602 = vst [vmem:[%s3554_s1 + $0x60] sm:$0xff] %v1492_v41 }
 0x211   : > { %v1429_v12 = vpop.f32.mrf.mxu0  ;;  %v1494_v19 = vpop.f32.mrf.mxu1 }
 0x212   : > { %v1495_v32 = vadd.f32 %v1494_v19, %v1429_v12 }
 0x214   : > { %1603 = vst [vmem:[%s3554_s1 + $0x68] sm:$0xff] %v1495_v32 }
 0x219   : > { %v1432_v58 = vpop.f32.mrf.mxu0  ;;  %v1497_v10 = vpop.f32.mrf.mxu1 }
 0x21a   : > { %v1498_v56 = vadd.f32 %v1497_v10, %v1432_v58 }
 0x21c   : > { %1604 = vst [vmem:[%s3554_s1 + $0x70] sm:$0xff] %v1498_v56 }
 0x221   : > { %v1435_v35 = vpop.f32.mrf.mxu0  ;;  %v1500_v20 = vpop.f32.mrf.mxu1 }
 0x222   : > { %v1501_v3 = vadd.f32 %v1500_v20, %v1435_v35 }
 0x224   : > { %1605 = vst [vmem:[%s3554_s1 + $0x78] sm:$0xff] %v1501_v3 }
 0x225   : > { %2199 = shalt.err (!%p2196_p0)
}
 0x226   : > { %s2271_s6 = smov 128   ;;  %s2272_s12 = smov 8  }
 0x227   : > { %1839 = dma.vmem_to_hbm [thread:$0]  (%p2390_p3), %s1620_s8, 2048, %s1622_s29, %s1607_s11, %s2271_s6, %s2271_s6, %s2272_s12  }
 0x228 PF: > { %s1636_s13 = sand.u32 1, %s2242_s15   ;;  %p1856_p5 = pnand %p1744_p11, %p2347_p6 }
 0x229   : > { %s1637_s7 = scalar_lea.sflag [#allocation5], %s1636_s13 }
 0x22a   : > { %p1857_p7 = pneg %p1856_p5 }
 0x22c   : > { %2237 = dma.done.wait (%p1857_p7), %s1637_s7, 2048  }
 0x22d   : > { %2239 = vsyncadd (%p1857_p7), %s1637_s7, 4294965248  ;;  %s22_s20 = sadd.s32 1, %s2262_s20   ;;  %s3773_s15 = smov %s2246_s16 }
 0x22e   : > { %p19_p9 = scmp.ge.s32.totalorder %s22_s20, 4   ;;  %s3774_s16 = smov %s2250_s17 }
 0x22f   : > { %s3775_s17 = smov %s2406_s24  ;;  %s3776_s18 = smov %s2258_s19 }
 0x230   : > { %s3777_s19 = smov %s3779_s9  ;;  %21 = sbr.rel (!%p19_p9) target bundleno = 11 (0xb), region = 108 }
 0x235   :  { %1643 = vsyncpa [#allocation4], 1 }
 0x236   :  { %1645 = vsyncpa [#allocation4 + $0x1], 1 }
 0x237   :  { %1646 = vsyncpa [#allocation7], 1 }
 0x238   :  { %1647 = vsyncpa [#allocation10], 1 }
 0x239   :  { %1648 = vsyncpa [#allocation5], 1 }
 0x23a   :  { %1650 = vsyncpa [#allocation5 + $0x1], 1 }

</bundles_post_ra>
